<compile_context>
chip_gen: v5e
topology: v5e:2x2
jax: 0.10.0
libtpu: 0.0.40
codegen_flags: <defaults>
</compile_context>

<pallas_src>
import jax
import jax.numpy as jnp
from jax import lax
from jax.experimental import pallas as pl
from jax.experimental.pallas import tpu as pltpu

# tag vocabulary (includes CRF start/stop tags, like the PyTorch tag_to_ix)
TAG_TO_ID = {"O": 0, "B-X": 1, "I-X": 2, "<START>": 3, "<STOP>": 4}
START_IDX = TAG_TO_ID["<START>"]
STOP_IDX = TAG_TO_ID["<STOP>"]


# ----------------------------------------------------------------------------
# Kernel 1: folded bidirectional LSTM (PyTorch gate order i, f, g, o)
#   * pre-pass: one batched (T*B, 2Din)@(2Din, 8H) input projection -> VMEM scratch
#   * recurrence: one (B, 2H)@(2H, 8H) matmul per timestep, both directions at once
# ----------------------------------------------------------------------------
def bilstm_kernel(xf_ref, wih_ref, whh_ref, b_ref, out_ref, xg_sc):
    # xf_ref : (T*B, 2*Din) bf16   rows ordered t*B + b, cols [x_fwd | x_rev]
    # wih_ref: (2*Din, 8H) bf16    block-diag folded, gate-major / dir-minor columns
    # whh_ref: (2H, 8H)   bf16     block-diag folded
    # b_ref  : (1, 8H)    f32
    # out_ref: (T, B, 2H) f32      lanes [h_fwd | h_bwd(reversed time)]
    # xg_sc  : VMEM (T, B, 8H) f32 scratch for the hoisted input projection
    T, B, G2 = out_ref.shape                         # G2 = 2H

    # --- pre-pass: ONE batched input projection over all timesteps ---
    xg_flat = jnp.dot(xf_ref[...], wih_ref[...],
                      preferred_element_type=jnp.float32) + b_ref[...]      # (T*B, 8H)
    for t in range(T):                               # static scatter to time-major scratch
        xg_sc[t] = xg_flat[t * B:(t + 1) * B, :]

    whh = whh_ref[...]

    # --- serial recurrence: a single merged h-projection per step ---
    def step(t, carry):
        h, c = carry
        g = xg_sc[t] + jnp.dot(h.astype(jnp.bfloat16), whh,
                               preferred_element_type=jnp.float32)          # (B, 8H)
        i_g = jax.nn.sigmoid(g[:, 0:G2])
        f_g = jax.nn.sigmoid(g[:, G2:2 * G2])
        g_g = jnp.tanh(g[:, 2 * G2:3 * G2])
        o_g = jax.nn.sigmoid(g[:, 3 * G2:4 * G2])
        c = f_g * c + i_g * g_g
        h = o_g * jnp.tanh(c)
        out_ref[t] = h
        return h, c

    h0 = jnp.zeros((B, G2), jnp.float32)
    c0 = jnp.zeros((B, G2), jnp.float32)
    lax.fori_loop(0, T, step, (h0, c0), unroll=True)


def bilstm(x_flat, wih, whh, bias, T, B):
    TB, Din2 = x_flat.shape
    G2, G8 = whh.shape                                                      # 2H, 8H
    flops = 2 * TB * Din2 * G8 + 2 * T * B * G2 * G8
    transcendentals = 5 * T * B * G2
    bytes_accessed = (x_flat.size * 2 + wih.size * 2 + whh.size * 2 +
                      bias.size * 4 + T * B * G2 * 4)
    return pl.pallas_call(
        bilstm_kernel,
        out_shape=jax.ShapeDtypeStruct((T, B, G2), jnp.float32),
        grid=(1,),
        in_specs=[
            pl.BlockSpec((TB, Din2), lambda i: (0, 0)),
            pl.BlockSpec((Din2, G8), lambda i: (0, 0)),
            pl.BlockSpec((G2, G8), lambda i: (0, 0)),
            pl.BlockSpec((1, G8), lambda i: (0, 0)),
        ],
        out_specs=pl.BlockSpec((T, B, G2), lambda i: (0, 0, 0)),
        scratch_shapes=[pltpu.VMEM((T, B, G8), jnp.float32)],
        compiler_params=pltpu.CompilerParams(
            dimension_semantics=("arbitrary",),
            vmem_limit_bytes=32 * 1024 * 1024),
        cost_estimate=pl.CostEstimate(flops=flops,
                                      transcendentals=transcendentals,
                                      bytes_accessed=bytes_accessed),
    )(x_flat, wih, whh, bias)


# ----------------------------------------------------------------------------
# Kernel 2: CRF decoder
#   * pre-pass: one batched (T*B, F)@(F, K) emission matmul -> VMEM scratch,
#     plus the gold emission score as a single masked reduce.
#   * serial forward algorithm with emit added AFTER the logsumexp.
#   transitions convention: trans[to, from].
# ----------------------------------------------------------------------------
def crf_kernel(featsf_ref, w_ref, b_ref, trans_ref, start_ref, stop_ref,
               ohm_ref, mask_ref, fwd_ref, gold_ref, emit_sc):
    # featsf: (T*B, F) bf16 (rows t*B+b)   w: (F, K) bf16   b/start/stop: (1, K) f32
    # trans : (K, K) f32                   ohm: (T*B, K) f32 = mask * one_hot(tags)
    # mask  : (T, B, 1) f32
    # fwd   : (B, 1) f32 forward (partition) scores
    # gold  : (1, 1) f32 batch-summed gold emission score
    # emit_sc: VMEM (T, B, K) f32
    T, B, K = emit_sc.shape

    # --- pre-pass: ONE batched emission projection + gold emission reduce ---
    emits_flat = jnp.dot(featsf_ref[...], w_ref[...],
                         preferred_element_type=jnp.float32) + b_ref[...]   # (T*B, K)
    gold_ref[...] = jnp.sum(ohm_ref[...] * emits_flat, keepdims=True)
    for t in range(T):
        emit_sc[t] = emits_flat[t * B:(t + 1) * B, :]

    trans = trans_ref[...]
    alpha0 = emit_sc[0] + start_ref[...]                                    # (B, K)

    # --- serial CRF forward recursion (no matmuls, no emit relayout) ---
    def step(t, alpha):
        mat = alpha[:, None, :] + trans[None, :, :]                         # (B, K, K)
        mmax = jnp.max(mat, axis=-1)                                        # (B, K)
        lse = mmax + jnp.log(jnp.sum(jnp.exp(mat - mmax[:, :, None]), axis=-1))
        alpha_new = emit_sc[t] + lse
        m_t = mask_ref[t]                                                   # (B, 1)
        return m_t * alpha_new + (1.0 - m_t) * alpha

    alpha = lax.fori_loop(1, T, step, alpha0, unroll=True)

    term = alpha + stop_ref[...]
    tmax = jnp.max(term, axis=-1, keepdims=True)
    fwd_ref[...] = tmax + jnp.log(jnp.sum(jnp.exp(term - tmax), axis=-1, keepdims=True))


def crf_score(feats_flat, w, b, trans, start_t, stop_t, ohm_flat, mask_tb1, T, B):
    TB, F = feats_flat.shape
    K = trans.shape[0]
    flops = 2 * TB * F * K + 4 * T * B * K * K
    transcendentals = T * B * K * (K + 2)
    bytes_accessed = (feats_flat.size * 2 + w.size * 2 + ohm_flat.size * 4 +
                      mask_tb1.size * 4 + trans.size * 4 + (B + 1) * 4)
    return pl.pallas_call(
        crf_kernel,
        out_shape=(jax.ShapeDtypeStruct((B, 1), jnp.float32),
                   jax.ShapeDtypeStruct((1, 1), jnp.float32)),
        grid=(1,),
        in_specs=[
            pl.BlockSpec((TB, F), lambda i: (0, 0)),
            pl.BlockSpec((F, K), lambda i: (0, 0)),
            pl.BlockSpec((1, K), lambda i: (0, 0)),
            pl.BlockSpec((K, K), lambda i: (0, 0)),
            pl.BlockSpec((1, K), lambda i: (0, 0)),
            pl.BlockSpec((1, K), lambda i: (0, 0)),
            pl.BlockSpec((TB, K), lambda i: (0, 0)),
            pl.BlockSpec((T, B, 1), lambda i: (0, 0, 0)),
        ],
        out_specs=(pl.BlockSpec((B, 1), lambda i: (0, 0)),
                   pl.BlockSpec((1, 1), lambda i: (0, 0))),
        scratch_shapes=[pltpu.VMEM((T, B, K), jnp.float32)],
        compiler_params=pltpu.CompilerParams(
            dimension_semantics=("arbitrary",),
            vmem_limit_bytes=32 * 1024 * 1024),
        cost_estimate=pl.CostEstimate(flops=flops,
                                      transcendentals=transcendentals,
                                      bytes_accessed=bytes_accessed),
    )(feats_flat, w, b, trans, start_t, stop_t, ohm_flat, mask_tb1)


# ----------------------------------------------------------------------------
# Parameter init (deterministic, synthetic) and weight folding helper
# ----------------------------------------------------------------------------
def init_params(key, word_vocab, word_emb_dim, word_hidden,
                char_vocab, char_emb_dim, char_out, tagset_size):
    keys = jax.random.split(key, 16)

    def u(k, shape, scale):
        return jax.random.uniform(k, shape, jnp.float32, -scale, scale)

    Din = word_emb_dim + char_out
    p = {}
    p["char_emb"] = u(keys[0], (char_vocab, char_emb_dim), (3.0 / char_emb_dim) ** 0.5)
    p["word_emb"] = u(keys[1], (word_vocab, word_emb_dim), (3.0 / word_emb_dim) ** 0.5)
    p["conv_w"] = u(keys[2], (char_out, char_emb_dim, 3),
                    (6.0 / (3 * char_emb_dim + char_out)) ** 0.5)   # Conv1d layout (Co, Ci, k)
    p["conv_b"] = jnp.zeros((1, char_out), jnp.float32)
    for d, kk in (("fwd", 3), ("bwd", 7)):
        p[f"wih_{d}"] = u(keys[kk], (Din, 4 * word_hidden),
                          (6.0 / (Din + 4 * word_hidden)) ** 0.5)
        p[f"whh_{d}"] = u(keys[kk + 1], (word_hidden, 4 * word_hidden),
                          (6.0 / (5 * word_hidden)) ** 0.5)
        p[f"b_{d}"] = jnp.zeros((1, 4 * word_hidden), jnp.float32)  # b_ih + b_hh combined
    p["h2t_w"] = u(keys[12], (2 * word_hidden, tagset_size),
                   (6.0 / (2 * word_hidden + tagset_size)) ** 0.5)
    p["h2t_b"] = jnp.zeros((1, tagset_size), jnp.float32)
    trans = u(keys[13], (tagset_size, tagset_size), 0.1)            # trans[to, from]
    trans = trans.at[START_IDX, :].set(-10000.0)                    # nothing goes TO start
    trans = trans.at[:, STOP_IDX].set(-10000.0)                     # nothing leaves stop
    p["trans"] = trans
    return p


def _fold_bidir(w_fwd, w_bwd, H):
    """Stack two per-direction (D, 4H) weights into a block-diagonal (2D, 8H) matrix
    with gate-major / direction-minor columns: col = gate*2H + (0..H-1 fwd | H..2H-1 bwd)."""
    Df, Db = w_fwd.shape[0], w_bwd.shape[0]
    top = jnp.concatenate([w_fwd.reshape(Df, 4, H),
                           jnp.zeros((Df, 4, H), w_fwd.dtype)], axis=-1)   # [W_fwd | 0]
    bot = jnp.concatenate([jnp.zeros((Db, 4, H), w_bwd.dtype),
                           w_bwd.reshape(Db, 4, H)], axis=-1)              # [0 | W_bwd]
    return jnp.concatenate([top, bot], axis=0).reshape(Df + Db, 8 * H)


# ----------------------------------------------------------------------------
# Full forward pass (glue: embedding gathers, char conv in XLA, per-length
# reversal, direction folding, gold transition-path precompute)
# ----------------------------------------------------------------------------
def cnn_bilstm_crf_forward(p, words, tags, chars, caps, wordslen, charslen, tagsmask):
    # TODO(synk): nn.Dropout(0.5) layers are treated as eval-mode identity.
    # TODO(synk): charslen is ignored; the char max-pool runs over all Lc positions
    #             (matches this synthetic data where charslen == Lc).
    del caps, charslen
    B, L = words.shape
    N, Lc = chars.shape
    Dc = p["char_emb"].shape[1]
    Co = p["conv_w"].shape[0]
    H = p["whh_fwd"].shape[0]
    K = p["trans"].shape[0]
    De = p["word_emb"].shape[1]
    Din = De + Co

    # --- char CNN encoder: conv1d(k=3, pad=1) as im2col matmul + max, in XLA ---
    chr_e = jnp.take(p["char_emb"], chars, axis=0)                    # (N, Lc, Dc)
    chr_t = jnp.transpose(chr_e, (1, 0, 2))                           # (Lc, N, Dc)
    chr_pad = jnp.pad(chr_t, ((1, 1), (0, 0), (0, 0)))
    im2col = jnp.concatenate(
        [chr_pad[0:Lc], chr_pad[1:Lc + 1], chr_pad[2:Lc + 2]], axis=-1)   # (Lc, N, 3*Dc)
    w_mat = jnp.transpose(p["conv_w"], (2, 1, 0)).reshape(3 * Dc, Co)
    conv = jnp.dot(im2col, w_mat) + p["conv_b"]                       # (Lc, N, Co)
    char_feat = jnp.max(conv, axis=0).reshape(B, L, Co)

    # --- word encoder (folded BiLSTM, pack_padded semantics via masking/reversal) ---
    w_e = jnp.take(p["word_emb"], words, axis=0)                      # (B, L, De)
    x = jnp.concatenate([w_e, char_feat], axis=-1)                    # (B, L, Din)
    mask = tagsmask.astype(jnp.float32)                               # (B, L)
    mask_tm = jnp.transpose(mask, (1, 0))                             # (L, B)
    lens = wordslen.astype(jnp.int32)

    t_idx = jnp.arange(L, dtype=jnp.int32)[None, :]
    rev_idx = jnp.where(t_idx < lens[:, None], lens[:, None] - 1 - t_idx, t_idx)  # (B, L)
    x_rev = jnp.take_along_axis(x, rev_idx[:, :, None], axis=1)

    x_tm = jnp.transpose(x, (1, 0, 2))                                # (L, B, Din)
    x_rev_tm = jnp.transpose(x_rev, (1, 0, 2))
    x_comb = jnp.concatenate([x_tm, x_rev_tm], axis=-1)               # (L, B, 2*Din)
    x_flat = x_comb.reshape(L * B, 2 * Din).astype(jnp.bfloat16)

    wih_c = _fold_bidir(p["wih_fwd"], p["wih_bwd"], H).astype(jnp.bfloat16)   # (2Din, 8H)
    whh_c = _fold_bidir(p["whh_fwd"], p["whh_bwd"], H).astype(jnp.bfloat16)   # (2H, 8H)
    b_c = jnp.concatenate([p["b_fwd"].reshape(1, 4, H),
                           p["b_bwd"].reshape(1, 4, H)], axis=-1).reshape(1, 8 * H)

    h_out = bilstm(x_flat, wih_c, whh_c, b_c, L, B)                   # (L, B, 2H)
    h_f = h_out[:, :, :H]
    rev_idx_tm = jnp.transpose(rev_idx, (1, 0))                       # (L, B)
    h_b = jnp.take_along_axis(h_out[:, :, H:], rev_idx_tm[:, :, None], axis=0)  # un-reverse
    word_feats_tm = jnp.concatenate([h_f, h_b], axis=-1) * mask_tm[:, :, None]  # (L, B, 2H)

    # --- CRF decoder: gold transition/start/stop path precomputed here ---
    prev_tags = jnp.concatenate(
        [jnp.full((B, 1), START_IDX, jnp.int32), tags[:, :-1]], axis=1)          # (B, L)
    trans_path = p["trans"][tags, prev_tags] * mask                              # (B, L)
    last_tag = jnp.take_along_axis(tags, (lens - 1)[:, None], axis=1)[:, 0]      # (B,)
    stop_path = p["trans"][STOP_IDX, last_tag]                                   # (B,)
    gold_rest = jnp.sum(trans_path) + jnp.sum(stop_path)                         # scalar

    onehot = jax.nn.one_hot(tags, K, dtype=jnp.float32)                          # (B, L, K)
    ohm_flat = jnp.transpose(onehot * mask[:, :, None], (1, 0, 2)).reshape(L * B, K)
    mask_tb1 = mask_tm[:, :, None]                                               # (L, B, 1)
    start_t = p["trans"][:, START_IDX][None, :]
    stop_t = p["trans"][STOP_IDX, :][None, :]

    feats_flat = word_feats_tm.reshape(L * B, 2 * H).astype(jnp.bfloat16)
    fwd, gold_emit = crf_score(feats_flat, p["h2t_w"].astype(jnp.bfloat16),
                               p["h2t_b"], p["trans"], start_t, stop_t,
                               ohm_flat, mask_tb1, L, B)
    # total NLL-style score: forward(partition) score minus gold path score, batch-summed
    return jnp.sum(fwd) - gold_rest - gold_emit[0, 0]


# ----------------------------------------------------------------------------
if __name__ == "__main__":
    B, L, Lc = 2, 8, 12
    word_vocab, De, H = 50, 16, 16
    char_vocab, Dc, Co = 30, 8, 16
    K = len(TAG_TO_ID)

    key = jax.random.PRNGKey(0)
    k_par, kw, kc, kt = jax.random.split(key, 4)

    params = init_params(k_par, word_vocab, De, H, char_vocab, Dc, Co, K)

    wordslen = jnp.array([8, 6], jnp.int32)                     # sorted descending (pack_padded)
    t_idx = jnp.arange(L)[None, :]
    tagsmask = (t_idx < wordslen[:, None]).astype(jnp.int32)    # (B, L)
    words = jax.random.randint(kw, (B, L), 1, word_vocab, dtype=jnp.int32) * tagsmask
    tags = jax.random.randint(kt, (B, L), 0, 3, dtype=jnp.int32) * tagsmask
    chars = jax.random.randint(kc, (B * L, Lc), 1, char_vocab, dtype=jnp.int32)
    charslen = jnp.full((B * L,), Lc, jnp.int32)
    caps = jnp.zeros((B, L), jnp.int32)

    score = jax.jit(cnn_bilstm_crf_forward)(
        params, words, tags, chars, caps, wordslen, charslen, tagsmask)
    jax.block_until_ready(score)
    print("KERNEL_OK")
</pallas_src>

<mosaic_0001>
module attributes {stable_mosaic.version = 11 : i64} {
  func.func @bilstm_kernel(%arg0: i32, %arg1: memref<16x64xbf16, #tpu.memory_space<vmem>>, %arg2: memref<64x128xbf16, #tpu.memory_space<vmem>>, %arg3: memref<32x128xbf16, #tpu.memory_space<vmem>>, %arg4: memref<1x128xf32, #tpu.memory_space<vmem>>, %arg5: memref<8x2x32xf32, #tpu.memory_space<vmem>>, %arg6: memref<8x2x128xf32, #tpu.memory_space<vmem>>) attributes {dimension_semantics = [#tpu.dimension_semantics<arbitrary>], iteration_bounds = array<i64: 1>, scalar_prefetch = 0 : i64, scratch_operands = 1 : i64, tpu.core_type = #tpu.core_type<tc>, window_params = [{pipeline_mode = #tpu.pipeline_mode<synchronous>, transform_indices = @transform_0, window_bounds = array<i64: 16, 64>}, {pipeline_mode = #tpu.pipeline_mode<synchronous>, transform_indices = @transform_1, window_bounds = array<i64: 64, 128>}, {pipeline_mode = #tpu.pipeline_mode<synchronous>, transform_indices = @transform_2, window_bounds = array<i64: 32, 128>}, {pipeline_mode = #tpu.pipeline_mode<synchronous>, transform_indices = @transform_3, window_bounds = array<i64: 1, 128>}, {pipeline_mode = #tpu.pipeline_mode<synchronous>, transform_indices = @transform_4, window_bounds = array<i64: 8, 2, 32>}]} {
    %c0 = arith.constant 0 : index
    %c0_0 = arith.constant 0 : index
    %0 = vector.load %arg1[%c0, %c0_0] : memref<16x64xbf16, #tpu.memory_space<vmem>>, vector<16x64xbf16>
    %c0_1 = arith.constant 0 : index
    %c0_2 = arith.constant 0 : index
    %1 = vector.load %arg2[%c0_1, %c0_2] : memref<64x128xbf16, #tpu.memory_space<vmem>>, vector<64x128xbf16>
    %cst = arith.constant dense<0.000000e+00> : vector<16x128xf32>
    %2 = tpu.matmul %0, %1, %cst {dimension_numbers = #tpu.dot_dimension_numbers<[1], [0], [0], [1], [0, 0, 1, 1], [], []>} : vector<16x64xbf16>, vector<64x128xbf16>, vector<16x128xf32> -> vector<16x128xf32>
    %c0_3 = arith.constant 0 : index
    %c0_4 = arith.constant 0 : index
    %3 = vector.load %arg4[%c0_3, %c0_4] : memref<1x128xf32, #tpu.memory_space<vmem>>, vector<1x128xf32>
    %4 = vector.broadcast %3 : vector<1x128xf32> to vector<16x128xf32>
    %5 = arith.addf %2, %4 : vector<16x128xf32>
    %6 = vector.extract_strided_slice %5 {offsets = [0, 0], sizes = [2, 128], strides = [1, 1]} : vector<16x128xf32> to vector<2x128xf32>
    %c0_5 = arith.constant 0 : index
    %c0_6 = arith.constant 0 : index
    %c0_7 = arith.constant 0 : index
    %7 = vector.load %arg6[%c0_5, %c0_6, %c0_7] : memref<8x2x128xf32, #tpu.memory_space<vmem>>, vector<1x2x128xf32>
    %8 = vector.shape_cast %7 : vector<1x2x128xf32> to vector<2x128xf32>
    %9 = vector.shape_cast %6 : vector<2x128xf32> to vector<1x2x128xf32>
    tpu.vector_store %arg6[%c0_5, %c0_6, %c0_7], %9 {strides = array<i32>} : memref<8x2x128xf32, #tpu.memory_space<vmem>>, vector<1x2x128xf32>,
    %10 = vector.extract_strided_slice %5 {offsets = [2, 0], sizes = [2, 128], strides = [1, 1]} : vector<16x128xf32> to vector<2x128xf32>
    %c1 = arith.constant 1 : index
    %c0_8 = arith.constant 0 : index
    %c0_9 = arith.constant 0 : index
    %11 = vector.load %arg6[%c1, %c0_8, %c0_9] : memref<8x2x128xf32, #tpu.memory_space<vmem>>, vector<1x2x128xf32>
    %12 = vector.shape_cast %11 : vector<1x2x128xf32> to vector<2x128xf32>
    %13 = vector.shape_cast %10 : vector<2x128xf32> to vector<1x2x128xf32>
    tpu.vector_store %arg6[%c1, %c0_8, %c0_9], %13 {strides = array<i32>} : memref<8x2x128xf32, #tpu.memory_space<vmem>>, vector<1x2x128xf32>,
    %14 = vector.extract_strided_slice %5 {offsets = [4, 0], sizes = [2, 128], strides = [1, 1]} : vector<16x128xf32> to vector<2x128xf32>
    %c2 = arith.constant 2 : index
    %c0_10 = arith.constant 0 : index
    %c0_11 = arith.constant 0 : index
    %15 = vector.load %arg6[%c2, %c0_10, %c0_11] : memref<8x2x128xf32, #tpu.memory_space<vmem>>, vector<1x2x128xf32>
    %16 = vector.shape_cast %15 : vector<1x2x128xf32> to vector<2x128xf32>
    %17 = vector.shape_cast %14 : vector<2x128xf32> to vector<1x2x128xf32>
    tpu.vector_store %arg6[%c2, %c0_10, %c0_11], %17 {strides = array<i32>} : memref<8x2x128xf32, #tpu.memory_space<vmem>>, vector<1x2x128xf32>,
    %18 = vector.extract_strided_slice %5 {offsets = [6, 0], sizes = [2, 128], strides = [1, 1]} : vector<16x128xf32> to vector<2x128xf32>
    %c3 = arith.constant 3 : index
    %c0_12 = arith.constant 0 : index
    %c0_13 = arith.constant 0 : index
    %19 = vector.load %arg6[%c3, %c0_12, %c0_13] : memref<8x2x128xf32, #tpu.memory_space<vmem>>, vector<1x2x128xf32>
    %20 = vector.shape_cast %19 : vector<1x2x128xf32> to vector<2x128xf32>
    %21 = vector.shape_cast %18 : vector<2x128xf32> to vector<1x2x128xf32>
    tpu.vector_store %arg6[%c3, %c0_12, %c0_13], %21 {strides = array<i32>} : memref<8x2x128xf32, #tpu.memory_space<vmem>>, vector<1x2x128xf32>,
    %22 = vector.extract_strided_slice %5 {offsets = [8, 0], sizes = [2, 128], strides = [1, 1]} : vector<16x128xf32> to vector<2x128xf32>
    %c4 = arith.constant 4 : index
    %c0_14 = arith.constant 0 : index
    %c0_15 = arith.constant 0 : index
    %23 = vector.load %arg6[%c4, %c0_14, %c0_15] : memref<8x2x128xf32, #tpu.memory_space<vmem>>, vector<1x2x128xf32>
    %24 = vector.shape_cast %23 : vector<1x2x128xf32> to vector<2x128xf32>
    %25 = vector.shape_cast %22 : vector<2x128xf32> to vector<1x2x128xf32>
    tpu.vector_store %arg6[%c4, %c0_14, %c0_15], %25 {strides = array<i32>} : memref<8x2x128xf32, #tpu.memory_space<vmem>>, vector<1x2x128xf32>,
    %26 = vector.extract_strided_slice %5 {offsets = [10, 0], sizes = [2, 128], strides = [1, 1]} : vector<16x128xf32> to vector<2x128xf32>
    %c5 = arith.constant 5 : index
    %c0_16 = arith.constant 0 : index
    %c0_17 = arith.constant 0 : index
    %27 = vector.load %arg6[%c5, %c0_16, %c0_17] : memref<8x2x128xf32, #tpu.memory_space<vmem>>, vector<1x2x128xf32>
    %28 = vector.shape_cast %27 : vector<1x2x128xf32> to vector<2x128xf32>
    %29 = vector.shape_cast %26 : vector<2x128xf32> to vector<1x2x128xf32>
    tpu.vector_store %arg6[%c5, %c0_16, %c0_17], %29 {strides = array<i32>} : memref<8x2x128xf32, #tpu.memory_space<vmem>>, vector<1x2x128xf32>,
    %30 = vector.extract_strided_slice %5 {offsets = [12, 0], sizes = [2, 128], strides = [1, 1]} : vector<16x128xf32> to vector<2x128xf32>
    %c6 = arith.constant 6 : index
    %c0_18 = arith.constant 0 : index
    %c0_19 = arith.constant 0 : index
    %31 = vector.load %arg6[%c6, %c0_18, %c0_19] : memref<8x2x128xf32, #tpu.memory_space<vmem>>, vector<1x2x128xf32>
    %32 = vector.shape_cast %31 : vector<1x2x128xf32> to vector<2x128xf32>
    %33 = vector.shape_cast %30 : vector<2x128xf32> to vector<1x2x128xf32>
    tpu.vector_store %arg6[%c6, %c0_18, %c0_19], %33 {strides = array<i32>} : memref<8x2x128xf32, #tpu.memory_space<vmem>>, vector<1x2x128xf32>,
    %34 = vector.extract_strided_slice %5 {offsets = [14, 0], sizes = [2, 128], strides = [1, 1]} : vector<16x128xf32> to vector<2x128xf32>
    %c7 = arith.constant 7 : index
    %c0_20 = arith.constant 0 : index
    %c0_21 = arith.constant 0 : index
    %35 = vector.load %arg6[%c7, %c0_20, %c0_21] : memref<8x2x128xf32, #tpu.memory_space<vmem>>, vector<1x2x128xf32>
    %36 = vector.shape_cast %35 : vector<1x2x128xf32> to vector<2x128xf32>
    %37 = vector.shape_cast %34 : vector<2x128xf32> to vector<1x2x128xf32>
    tpu.vector_store %arg6[%c7, %c0_20, %c0_21], %37 {strides = array<i32>} : memref<8x2x128xf32, #tpu.memory_space<vmem>>, vector<1x2x128xf32>,
    %c0_22 = arith.constant 0 : index
    %c0_23 = arith.constant 0 : index
    %38 = vector.load %arg3[%c0_22, %c0_23] : memref<32x128xbf16, #tpu.memory_space<vmem>>, vector<32x128xbf16>
    %cst_24 = arith.constant 0.000000e+00 : f32
    %39 = vector.broadcast %cst_24 : f32 to vector<2x32xf32>
    %cst_25 = arith.constant 0.000000e+00 : f32
    %40 = vector.broadcast %cst_25 : f32 to vector<2x32xf32>
    %c0_i32 = arith.constant 0 : i32
    %41 = arith.index_cast %c0_i32 : i32 to index
    %c0_26 = arith.constant 0 : index
    %c0_27 = arith.constant 0 : index
    %42 = vector.load %arg6[%41, %c0_26, %c0_27] : memref<8x2x128xf32, #tpu.memory_space<vmem>>, vector<1x2x128xf32>
    %43 = vector.shape_cast %42 : vector<1x2x128xf32> to vector<2x128xf32>
    %44 = arith.truncf %39 : vector<2x32xf32> to vector<2x32xbf16>
    %cst_28 = arith.constant dense<0.000000e+00> : vector<2x128xf32>
    %45 = tpu.matmul %44, %38, %cst_28 {dimension_numbers = #tpu.dot_dimension_numbers<[1], [0], [0], [1], [0, 0, 1, 1], [], []>} : vector<2x32xbf16>, vector<32x128xbf16>, vector<2x128xf32> -> vector<2x128xf32>
    %46 = arith.addf %43, %45 : vector<2x128xf32>
    %47 = vector.extract_strided_slice %46 {offsets = [0, 0], sizes = [2, 32], strides = [1, 1]} : vector<2x128xf32> to vector<2x32xf32>
    %48 = arith.negf %47 : vector<2x32xf32>
    %49 = math.exp %48 : vector<2x32xf32>
    %cst_29 = arith.constant 1.000000e+00 : f32
    %50 = vector.broadcast %cst_29 : f32 to vector<2x32xf32>
    %51 = arith.addf %50, %49 : vector<2x32xf32>
    %52 = arith.divf %50, %51 : vector<2x32xf32>
    %53 = vector.extract_strided_slice %46 {offsets = [0, 32], sizes = [2, 32], strides = [1, 1]} : vector<2x128xf32> to vector<2x32xf32>
    %54 = arith.negf %53 : vector<2x32xf32>
    %55 = math.exp %54 : vector<2x32xf32>
    %cst_30 = arith.constant 1.000000e+00 : f32
    %56 = vector.broadcast %cst_30 : f32 to vector<2x32xf32>
    %57 = arith.addf %56, %55 : vector<2x32xf32>
    %58 = arith.divf %56, %57 : vector<2x32xf32>
    %59 = vector.extract_strided_slice %46 {offsets = [0, 64], sizes = [2, 32], strides = [1, 1]} : vector<2x128xf32> to vector<2x32xf32>
    %60 = math.tanh %59 : vector<2x32xf32>
    %61 = vector.extract_strided_slice %46 {offsets = [0, 96], sizes = [2, 32], strides = [1, 1]} : vector<2x128xf32> to vector<2x32xf32>
    %62 = arith.negf %61 : vector<2x32xf32>
    %63 = math.exp %62 : vector<2x32xf32>
    %cst_31 = arith.constant 1.000000e+00 : f32
    %64 = vector.broadcast %cst_31 : f32 to vector<2x32xf32>
    %65 = arith.addf %64, %63 : vector<2x32xf32>
    %66 = arith.divf %64, %65 : vector<2x32xf32>
    %67 = arith.mulf %58, %40 : vector<2x32xf32>
    %68 = arith.mulf %52, %60 : vector<2x32xf32>
    %69 = arith.addf %67, %68 : vector<2x32xf32>
    %70 = math.tanh %69 : vector<2x32xf32>
    %71 = arith.mulf %66, %70 : vector<2x32xf32>
    %72 = arith.index_cast %c0_i32 : i32 to index
    %c0_32 = arith.constant 0 : index
    %c0_33 = arith.constant 0 : index
    %73 = vector.load %arg5[%72, %c0_32, %c0_33] : memref<8x2x32xf32, #tpu.memory_space<vmem>>, vector<1x2x32xf32>
    %74 = vector.shape_cast %73 : vector<1x2x32xf32> to vector<2x32xf32>
    %75 = vector.shape_cast %71 : vector<2x32xf32> to vector<1x2x32xf32>
    tpu.vector_store %arg5[%72, %c0_32, %c0_33], %75 {strides = array<i32>} : memref<8x2x32xf32, #tpu.memory_space<vmem>>, vector<1x2x32xf32>,
    %c1_i32 = arith.constant 1 : i32
    %76 = arith.index_cast %c1_i32 : i32 to index
    %c0_34 = arith.constant 0 : index
    %c0_35 = arith.constant 0 : index
    %77 = vector.load %arg6[%76, %c0_34, %c0_35] : memref<8x2x128xf32, #tpu.memory_space<vmem>>, vector<1x2x128xf32>
    %78 = vector.shape_cast %77 : vector<1x2x128xf32> to vector<2x128xf32>
    %79 = arith.truncf %71 : vector<2x32xf32> to vector<2x32xbf16>
    %cst_36 = arith.constant dense<0.000000e+00> : vector<2x128xf32>
    %80 = tpu.matmul %79, %38, %cst_36 {dimension_numbers = #tpu.dot_dimension_numbers<[1], [0], [0], [1], [0, 0, 1, 1], [], []>} : vector<2x32xbf16>, vector<32x128xbf16>, vector<2x128xf32> -> vector<2x128xf32>
    %81 = arith.addf %78, %80 : vector<2x128xf32>
    %82 = vector.extract_strided_slice %81 {offsets = [0, 0], sizes = [2, 32], strides = [1, 1]} : vector<2x128xf32> to vector<2x32xf32>
    %83 = arith.negf %82 : vector<2x32xf32>
    %84 = math.exp %83 : vector<2x32xf32>
    %cst_37 = arith.constant 1.000000e+00 : f32
    %85 = vector.broadcast %cst_37 : f32 to vector<2x32xf32>
    %86 = arith.addf %85, %84 : vector<2x32xf32>
    %87 = arith.divf %85, %86 : vector<2x32xf32>
    %88 = vector.extract_strided_slice %81 {offsets = [0, 32], sizes = [2, 32], strides = [1, 1]} : vector<2x128xf32> to vector<2x32xf32>
    %89 = arith.negf %88 : vector<2x32xf32>
    %90 = math.exp %89 : vector<2x32xf32>
    %cst_38 = arith.constant 1.000000e+00 : f32
    %91 = vector.broadcast %cst_38 : f32 to vector<2x32xf32>
    %92 = arith.addf %91, %90 : vector<2x32xf32>
    %93 = arith.divf %91, %92 : vector<2x32xf32>
    %94 = vector.extract_strided_slice %81 {offsets = [0, 64], sizes = [2, 32], strides = [1, 1]} : vector<2x128xf32> to vector<2x32xf32>
    %95 = math.tanh %94 : vector<2x32xf32>
    %96 = vector.extract_strided_slice %81 {offsets = [0, 96], sizes = [2, 32], strides = [1, 1]} : vector<2x128xf32> to vector<2x32xf32>
    %97 = arith.negf %96 : vector<2x32xf32>
    %98 = math.exp %97 : vector<2x32xf32>
    %cst_39 = arith.constant 1.000000e+00 : f32
    %99 = vector.broadcast %cst_39 : f32 to vector<2x32xf32>
    %100 = arith.addf %99, %98 : vector<2x32xf32>
    %101 = arith.divf %99, %100 : vector<2x32xf32>
    %102 = arith.mulf %93, %69 : vector<2x32xf32>
    %103 = arith.mulf %87, %95 : vector<2x32xf32>
    %104 = arith.addf %102, %103 : vector<2x32xf32>
    %105 = math.tanh %104 : vector<2x32xf32>
    %106 = arith.mulf %101, %105 : vector<2x32xf32>
    %107 = arith.index_cast %c1_i32 : i32 to index
    %c0_40 = arith.constant 0 : index
    %c0_41 = arith.constant 0 : index
    %108 = vector.load %arg5[%107, %c0_40, %c0_41] : memref<8x2x32xf32, #tpu.memory_space<vmem>>, vector<1x2x32xf32>
    %109 = vector.shape_cast %108 : vector<1x2x32xf32> to vector<2x32xf32>
    %110 = vector.shape_cast %106 : vector<2x32xf32> to vector<1x2x32xf32>
    tpu.vector_store %arg5[%107, %c0_40, %c0_41], %110 {strides = array<i32>} : memref<8x2x32xf32, #tpu.memory_space<vmem>>, vector<1x2x32xf32>,
    %c2_i32 = arith.constant 2 : i32
    %111 = arith.index_cast %c2_i32 : i32 to index
    %c0_42 = arith.constant 0 : index
    %c0_43 = arith.constant 0 : index
    %112 = vector.load %arg6[%111, %c0_42, %c0_43] : memref<8x2x128xf32, #tpu.memory_space<vmem>>, vector<1x2x128xf32>
    %113 = vector.shape_cast %112 : vector<1x2x128xf32> to vector<2x128xf32>
    %114 = arith.truncf %106 : vector<2x32xf32> to vector<2x32xbf16>
    %cst_44 = arith.constant dense<0.000000e+00> : vector<2x128xf32>
    %115 = tpu.matmul %114, %38, %cst_44 {dimension_numbers = #tpu.dot_dimension_numbers<[1], [0], [0], [1], [0, 0, 1, 1], [], []>} : vector<2x32xbf16>, vector<32x128xbf16>, vector<2x128xf32> -> vector<2x128xf32>
    %116 = arith.addf %113, %115 : vector<2x128xf32>
    %117 = vector.extract_strided_slice %116 {offsets = [0, 0], sizes = [2, 32], strides = [1, 1]} : vector<2x128xf32> to vector<2x32xf32>
    %118 = arith.negf %117 : vector<2x32xf32>
    %119 = math.exp %118 : vector<2x32xf32>
    %cst_45 = arith.constant 1.000000e+00 : f32
    %120 = vector.broadcast %cst_45 : f32 to vector<2x32xf32>
    %121 = arith.addf %120, %119 : vector<2x32xf32>
    %122 = arith.divf %120, %121 : vector<2x32xf32>
    %123 = vector.extract_strided_slice %116 {offsets = [0, 32], sizes = [2, 32], strides = [1, 1]} : vector<2x128xf32> to vector<2x32xf32>
    %124 = arith.negf %123 : vector<2x32xf32>
    %125 = math.exp %124 : vector<2x32xf32>
    %cst_46 = arith.constant 1.000000e+00 : f32
    %126 = vector.broadcast %cst_46 : f32 to vector<2x32xf32>
    %127 = arith.addf %126, %125 : vector<2x32xf32>
    %128 = arith.divf %126, %127 : vector<2x32xf32>
    %129 = vector.extract_strided_slice %116 {offsets = [0, 64], sizes = [2, 32], strides = [1, 1]} : vector<2x128xf32> to vector<2x32xf32>
    %130 = math.tanh %129 : vector<2x32xf32>
    %131 = vector.extract_strided_slice %116 {offsets = [0, 96], sizes = [2, 32], strides = [1, 1]} : vector<2x128xf32> to vector<2x32xf32>
    %132 = arith.negf %131 : vector<2x32xf32>
    %133 = math.exp %132 : vector<2x32xf32>
    %cst_47 = arith.constant 1.000000e+00 : f32
    %134 = vector.broadcast %cst_47 : f32 to vector<2x32xf32>
    %135 = arith.addf %134, %133 : vector<2x32xf32>
    %136 = arith.divf %134, %135 : vector<2x32xf32>
    %137 = arith.mulf %128, %104 : vector<2x32xf32>
    %138 = arith.mulf %122, %130 : vector<2x32xf32>
    %139 = arith.addf %137, %138 : vector<2x32xf32>
    %140 = math.tanh %139 : vector<2x32xf32>
    %141 = arith.mulf %136, %140 : vector<2x32xf32>
    %142 = arith.index_cast %c2_i32 : i32 to index
    %c0_48 = arith.constant 0 : index
    %c0_49 = arith.constant 0 : index
    %143 = vector.load %arg5[%142, %c0_48, %c0_49] : memref<8x2x32xf32, #tpu.memory_space<vmem>>, vector<1x2x32xf32>
    %144 = vector.shape_cast %143 : vector<1x2x32xf32> to vector<2x32xf32>
    %145 = vector.shape_cast %141 : vector<2x32xf32> to vector<1x2x32xf32>
    tpu.vector_store %arg5[%142, %c0_48, %c0_49], %145 {strides = array<i32>} : memref<8x2x32xf32, #tpu.memory_space<vmem>>, vector<1x2x32xf32>,
    %c3_i32 = arith.constant 3 : i32
    %146 = arith.index_cast %c3_i32 : i32 to index
    %c0_50 = arith.constant 0 : index
    %c0_51 = arith.constant 0 : index
    %147 = vector.load %arg6[%146, %c0_50, %c0_51] : memref<8x2x128xf32, #tpu.memory_space<vmem>>, vector<1x2x128xf32>
    %148 = vector.shape_cast %147 : vector<1x2x128xf32> to vector<2x128xf32>
    %149 = arith.truncf %141 : vector<2x32xf32> to vector<2x32xbf16>
    %cst_52 = arith.constant dense<0.000000e+00> : vector<2x128xf32>
    %150 = tpu.matmul %149, %38, %cst_52 {dimension_numbers = #tpu.dot_dimension_numbers<[1], [0], [0], [1], [0, 0, 1, 1], [], []>} : vector<2x32xbf16>, vector<32x128xbf16>, vector<2x128xf32> -> vector<2x128xf32>
    %151 = arith.addf %148, %150 : vector<2x128xf32>
    %152 = vector.extract_strided_slice %151 {offsets = [0, 0], sizes = [2, 32], strides = [1, 1]} : vector<2x128xf32> to vector<2x32xf32>
    %153 = arith.negf %152 : vector<2x32xf32>
    %154 = math.exp %153 : vector<2x32xf32>
    %cst_53 = arith.constant 1.000000e+00 : f32
    %155 = vector.broadcast %cst_53 : f32 to vector<2x32xf32>
    %156 = arith.addf %155, %154 : vector<2x32xf32>
    %157 = arith.divf %155, %156 : vector<2x32xf32>
    %158 = vector.extract_strided_slice %151 {offsets = [0, 32], sizes = [2, 32], strides = [1, 1]} : vector<2x128xf32> to vector<2x32xf32>
    %159 = arith.negf %158 : vector<2x32xf32>
    %160 = math.exp %159 : vector<2x32xf32>
    %cst_54 = arith.constant 1.000000e+00 : f32
    %161 = vector.broadcast %cst_54 : f32 to vector<2x32xf32>
    %162 = arith.addf %161, %160 : vector<2x32xf32>
    %163 = arith.divf %161, %162 : vector<2x32xf32>
    %164 = vector.extract_strided_slice %151 {offsets = [0, 64], sizes = [2, 32], strides = [1, 1]} : vector<2x128xf32> to vector<2x32xf32>
    %165 = math.tanh %164 : vector<2x32xf32>
    %166 = vector.extract_strided_slice %151 {offsets = [0, 96], sizes = [2, 32], strides = [1, 1]} : vector<2x128xf32> to vector<2x32xf32>
    %167 = arith.negf %166 : vector<2x32xf32>
    %168 = math.exp %167 : vector<2x32xf32>
    %cst_55 = arith.constant 1.000000e+00 : f32
    %169 = vector.broadcast %cst_55 : f32 to vector<2x32xf32>
    %170 = arith.addf %169, %168 : vector<2x32xf32>
    %171 = arith.divf %169, %170 : vector<2x32xf32>
    %172 = arith.mulf %163, %139 : vector<2x32xf32>
    %173 = arith.mulf %157, %165 : vector<2x32xf32>
    %174 = arith.addf %172, %173 : vector<2x32xf32>
    %175 = math.tanh %174 : vector<2x32xf32>
    %176 = arith.mulf %171, %175 : vector<2x32xf32>
    %177 = arith.index_cast %c3_i32 : i32 to index
    %c0_56 = arith.constant 0 : index
    %c0_57 = arith.constant 0 : index
    %178 = vector.load %arg5[%177, %c0_56, %c0_57] : memref<8x2x32xf32, #tpu.memory_space<vmem>>, vector<1x2x32xf32>
    %179 = vector.shape_cast %178 : vector<1x2x32xf32> to vector<2x32xf32>
    %180 = vector.shape_cast %176 : vector<2x32xf32> to vector<1x2x32xf32>
    tpu.vector_store %arg5[%177, %c0_56, %c0_57], %180 {strides = array<i32>} : memref<8x2x32xf32, #tpu.memory_space<vmem>>, vector<1x2x32xf32>,
    %c4_i32 = arith.constant 4 : i32
    %181 = arith.index_cast %c4_i32 : i32 to index
    %c0_58 = arith.constant 0 : index
    %c0_59 = arith.constant 0 : index
    %182 = vector.load %arg6[%181, %c0_58, %c0_59] : memref<8x2x128xf32, #tpu.memory_space<vmem>>, vector<1x2x128xf32>
    %183 = vector.shape_cast %182 : vector<1x2x128xf32> to vector<2x128xf32>
    %184 = arith.truncf %176 : vector<2x32xf32> to vector<2x32xbf16>
    %cst_60 = arith.constant dense<0.000000e+00> : vector<2x128xf32>
    %185 = tpu.matmul %184, %38, %cst_60 {dimension_numbers = #tpu.dot_dimension_numbers<[1], [0], [0], [1], [0, 0, 1, 1], [], []>} : vector<2x32xbf16>, vector<32x128xbf16>, vector<2x128xf32> -> vector<2x128xf32>
    %186 = arith.addf %183, %185 : vector<2x128xf32>
    %187 = vector.extract_strided_slice %186 {offsets = [0, 0], sizes = [2, 32], strides = [1, 1]} : vector<2x128xf32> to vector<2x32xf32>
    %188 = arith.negf %187 : vector<2x32xf32>
    %189 = math.exp %188 : vector<2x32xf32>
    %cst_61 = arith.constant 1.000000e+00 : f32
    %190 = vector.broadcast %cst_61 : f32 to vector<2x32xf32>
    %191 = arith.addf %190, %189 : vector<2x32xf32>
    %192 = arith.divf %190, %191 : vector<2x32xf32>
    %193 = vector.extract_strided_slice %186 {offsets = [0, 32], sizes = [2, 32], strides = [1, 1]} : vector<2x128xf32> to vector<2x32xf32>
    %194 = arith.negf %193 : vector<2x32xf32>
    %195 = math.exp %194 : vector<2x32xf32>
    %cst_62 = arith.constant 1.000000e+00 : f32
    %196 = vector.broadcast %cst_62 : f32 to vector<2x32xf32>
    %197 = arith.addf %196, %195 : vector<2x32xf32>
    %198 = arith.divf %196, %197 : vector<2x32xf32>
    %199 = vector.extract_strided_slice %186 {offsets = [0, 64], sizes = [2, 32], strides = [1, 1]} : vector<2x128xf32> to vector<2x32xf32>
    %200 = math.tanh %199 : vector<2x32xf32>
    %201 = vector.extract_strided_slice %186 {offsets = [0, 96], sizes = [2, 32], strides = [1, 1]} : vector<2x128xf32> to vector<2x32xf32>
    %202 = arith.negf %201 : vector<2x32xf32>
    %203 = math.exp %202 : vector<2x32xf32>
    %cst_63 = arith.constant 1.000000e+00 : f32
    %204 = vector.broadcast %cst_63 : f32 to vector<2x32xf32>
    %205 = arith.addf %204, %203 : vector<2x32xf32>
    %206 = arith.divf %204, %205 : vector<2x32xf32>
    %207 = arith.mulf %198, %174 : vector<2x32xf32>
    %208 = arith.mulf %192, %200 : vector<2x32xf32>
    %209 = arith.addf %207, %208 : vector<2x32xf32>
    %210 = math.tanh %209 : vector<2x32xf32>
    %211 = arith.mulf %206, %210 : vector<2x32xf32>
    %212 = arith.index_cast %c4_i32 : i32 to index
    %c0_64 = arith.constant 0 : index
    %c0_65 = arith.constant 0 : index
    %213 = vector.load %arg5[%212, %c0_64, %c0_65] : memref<8x2x32xf32, #tpu.memory_space<vmem>>, vector<1x2x32xf32>
    %214 = vector.shape_cast %213 : vector<1x2x32xf32> to vector<2x32xf32>
    %215 = vector.shape_cast %211 : vector<2x32xf32> to vector<1x2x32xf32>
    tpu.vector_store %arg5[%212, %c0_64, %c0_65], %215 {strides = array<i32>} : memref<8x2x32xf32, #tpu.memory_space<vmem>>, vector<1x2x32xf32>,
    %c5_i32 = arith.constant 5 : i32
    %216 = arith.index_cast %c5_i32 : i32 to index
    %c0_66 = arith.constant 0 : index
    %c0_67 = arith.constant 0 : index
    %217 = vector.load %arg6[%216, %c0_66, %c0_67] : memref<8x2x128xf32, #tpu.memory_space<vmem>>, vector<1x2x128xf32>
    %218 = vector.shape_cast %217 : vector<1x2x128xf32> to vector<2x128xf32>
    %219 = arith.truncf %211 : vector<2x32xf32> to vector<2x32xbf16>
    %cst_68 = arith.constant dense<0.000000e+00> : vector<2x128xf32>
    %220 = tpu.matmul %219, %38, %cst_68 {dimension_numbers = #tpu.dot_dimension_numbers<[1], [0], [0], [1], [0, 0, 1, 1], [], []>} : vector<2x32xbf16>, vector<32x128xbf16>, vector<2x128xf32> -> vector<2x128xf32>
    %221 = arith.addf %218, %220 : vector<2x128xf32>
    %222 = vector.extract_strided_slice %221 {offsets = [0, 0], sizes = [2, 32], strides = [1, 1]} : vector<2x128xf32> to vector<2x32xf32>
    %223 = arith.negf %222 : vector<2x32xf32>
    %224 = math.exp %223 : vector<2x32xf32>
    %cst_69 = arith.constant 1.000000e+00 : f32
    %225 = vector.broadcast %cst_69 : f32 to vector<2x32xf32>
    %226 = arith.addf %225, %224 : vector<2x32xf32>
    %227 = arith.divf %225, %226 : vector<2x32xf32>
    %228 = vector.extract_strided_slice %221 {offsets = [0, 32], sizes = [2, 32], strides = [1, 1]} : vector<2x128xf32> to vector<2x32xf32>
    %229 = arith.negf %228 : vector<2x32xf32>
    %230 = math.exp %229 : vector<2x32xf32>
    %cst_70 = arith.constant 1.000000e+00 : f32
    %231 = vector.broadcast %cst_70 : f32 to vector<2x32xf32>
    %232 = arith.addf %231, %230 : vector<2x32xf32>
    %233 = arith.divf %231, %232 : vector<2x32xf32>
    %234 = vector.extract_strided_slice %221 {offsets = [0, 64], sizes = [2, 32], strides = [1, 1]} : vector<2x128xf32> to vector<2x32xf32>
    %235 = math.tanh %234 : vector<2x32xf32>
    %236 = vector.extract_strided_slice %221 {offsets = [0, 96], sizes = [2, 32], strides = [1, 1]} : vector<2x128xf32> to vector<2x32xf32>
    %237 = arith.negf %236 : vector<2x32xf32>
    %238 = math.exp %237 : vector<2x32xf32>
    %cst_71 = arith.constant 1.000000e+00 : f32
    %239 = vector.broadcast %cst_71 : f32 to vector<2x32xf32>
    %240 = arith.addf %239, %238 : vector<2x32xf32>
    %241 = arith.divf %239, %240 : vector<2x32xf32>
    %242 = arith.mulf %233, %209 : vector<2x32xf32>
    %243 = arith.mulf %227, %235 : vector<2x32xf32>
    %244 = arith.addf %242, %243 : vector<2x32xf32>
    %245 = math.tanh %244 : vector<2x32xf32>
    %246 = arith.mulf %241, %245 : vector<2x32xf32>
    %247 = arith.index_cast %c5_i32 : i32 to index
    %c0_72 = arith.constant 0 : index
    %c0_73 = arith.constant 0 : index
    %248 = vector.load %arg5[%247, %c0_72, %c0_73] : memref<8x2x32xf32, #tpu.memory_space<vmem>>, vector<1x2x32xf32>
    %249 = vector.shape_cast %248 : vector<1x2x32xf32> to vector<2x32xf32>
    %250 = vector.shape_cast %246 : vector<2x32xf32> to vector<1x2x32xf32>
    tpu.vector_store %arg5[%247, %c0_72, %c0_73], %250 {strides = array<i32>} : memref<8x2x32xf32, #tpu.memory_space<vmem>>, vector<1x2x32xf32>,
    %c6_i32 = arith.constant 6 : i32
    %251 = arith.index_cast %c6_i32 : i32 to index
    %c0_74 = arith.constant 0 : index
    %c0_75 = arith.constant 0 : index
    %252 = vector.load %arg6[%251, %c0_74, %c0_75] : memref<8x2x128xf32, #tpu.memory_space<vmem>>, vector<1x2x128xf32>
    %253 = vector.shape_cast %252 : vector<1x2x128xf32> to vector<2x128xf32>
    %254 = arith.truncf %246 : vector<2x32xf32> to vector<2x32xbf16>
    %cst_76 = arith.constant dense<0.000000e+00> : vector<2x128xf32>
    %255 = tpu.matmul %254, %38, %cst_76 {dimension_numbers = #tpu.dot_dimension_numbers<[1], [0], [0], [1], [0, 0, 1, 1], [], []>} : vector<2x32xbf16>, vector<32x128xbf16>, vector<2x128xf32> -> vector<2x128xf32>
    %256 = arith.addf %253, %255 : vector<2x128xf32>
    %257 = vector.extract_strided_slice %256 {offsets = [0, 0], sizes = [2, 32], strides = [1, 1]} : vector<2x128xf32> to vector<2x32xf32>
    %258 = arith.negf %257 : vector<2x32xf32>
    %259 = math.exp %258 : vector<2x32xf32>
    %cst_77 = arith.constant 1.000000e+00 : f32
    %260 = vector.broadcast %cst_77 : f32 to vector<2x32xf32>
    %261 = arith.addf %260, %259 : vector<2x32xf32>
    %262 = arith.divf %260, %261 : vector<2x32xf32>
    %263 = vector.extract_strided_slice %256 {offsets = [0, 32], sizes = [2, 32], strides = [1, 1]} : vector<2x128xf32> to vector<2x32xf32>
    %264 = arith.negf %263 : vector<2x32xf32>
    %265 = math.exp %264 : vector<2x32xf32>
    %cst_78 = arith.constant 1.000000e+00 : f32
    %266 = vector.broadcast %cst_78 : f32 to vector<2x32xf32>
    %267 = arith.addf %266, %265 : vector<2x32xf32>
    %268 = arith.divf %266, %267 : vector<2x32xf32>
    %269 = vector.extract_strided_slice %256 {offsets = [0, 64], sizes = [2, 32], strides = [1, 1]} : vector<2x128xf32> to vector<2x32xf32>
    %270 = math.tanh %269 : vector<2x32xf32>
    %271 = vector.extract_strided_slice %256 {offsets = [0, 96], sizes = [2, 32], strides = [1, 1]} : vector<2x128xf32> to vector<2x32xf32>
    %272 = arith.negf %271 : vector<2x32xf32>
    %273 = math.exp %272 : vector<2x32xf32>
    %cst_79 = arith.constant 1.000000e+00 : f32
    %274 = vector.broadcast %cst_79 : f32 to vector<2x32xf32>
    %275 = arith.addf %274, %273 : vector<2x32xf32>
    %276 = arith.divf %274, %275 : vector<2x32xf32>
    %277 = arith.mulf %268, %244 : vector<2x32xf32>
    %278 = arith.mulf %262, %270 : vector<2x32xf32>
    %279 = arith.addf %277, %278 : vector<2x32xf32>
    %280 = math.tanh %279 : vector<2x32xf32>
    %281 = arith.mulf %276, %280 : vector<2x32xf32>
    %282 = arith.index_cast %c6_i32 : i32 to index
    %c0_80 = arith.constant 0 : index
    %c0_81 = arith.constant 0 : index
    %283 = vector.load %arg5[%282, %c0_80, %c0_81] : memref<8x2x32xf32, #tpu.memory_space<vmem>>, vector<1x2x32xf32>
    %284 = vector.shape_cast %283 : vector<1x2x32xf32> to vector<2x32xf32>
    %285 = vector.shape_cast %281 : vector<2x32xf32> to vector<1x2x32xf32>
    tpu.vector_store %arg5[%282, %c0_80, %c0_81], %285 {strides = array<i32>} : memref<8x2x32xf32, #tpu.memory_space<vmem>>, vector<1x2x32xf32>,
    %c7_i32 = arith.constant 7 : i32
    %286 = arith.index_cast %c7_i32 : i32 to index
    %c0_82 = arith.constant 0 : index
    %c0_83 = arith.constant 0 : index
    %287 = vector.load %arg6[%286, %c0_82, %c0_83] : memref<8x2x128xf32, #tpu.memory_space<vmem>>, vector<1x2x128xf32>
    %288 = vector.shape_cast %287 : vector<1x2x128xf32> to vector<2x128xf32>
    %289 = arith.truncf %281 : vector<2x32xf32> to vector<2x32xbf16>
    %cst_84 = arith.constant dense<0.000000e+00> : vector<2x128xf32>
    %290 = tpu.matmul %289, %38, %cst_84 {dimension_numbers = #tpu.dot_dimension_numbers<[1], [0], [0], [1], [0, 0, 1, 1], [], []>} : vector<2x32xbf16>, vector<32x128xbf16>, vector<2x128xf32> -> vector<2x128xf32>
    %291 = arith.addf %288, %290 : vector<2x128xf32>
    %292 = vector.extract_strided_slice %291 {offsets = [0, 0], sizes = [2, 32], strides = [1, 1]} : vector<2x128xf32> to vector<2x32xf32>
    %293 = arith.negf %292 : vector<2x32xf32>
    %294 = math.exp %293 : vector<2x32xf32>
    %cst_85 = arith.constant 1.000000e+00 : f32
    %295 = vector.broadcast %cst_85 : f32 to vector<2x32xf32>
    %296 = arith.addf %295, %294 : vector<2x32xf32>
    %297 = arith.divf %295, %296 : vector<2x32xf32>
    %298 = vector.extract_strided_slice %291 {offsets = [0, 32], sizes = [2, 32], strides = [1, 1]} : vector<2x128xf32> to vector<2x32xf32>
    %299 = arith.negf %298 : vector<2x32xf32>
    %300 = math.exp %299 : vector<2x32xf32>
    %cst_86 = arith.constant 1.000000e+00 : f32
    %301 = vector.broadcast %cst_86 : f32 to vector<2x32xf32>
    %302 = arith.addf %301, %300 : vector<2x32xf32>
    %303 = arith.divf %301, %302 : vector<2x32xf32>
    %304 = vector.extract_strided_slice %291 {offsets = [0, 64], sizes = [2, 32], strides = [1, 1]} : vector<2x128xf32> to vector<2x32xf32>
    %305 = math.tanh %304 : vector<2x32xf32>
    %306 = vector.extract_strided_slice %291 {offsets = [0, 96], sizes = [2, 32], strides = [1, 1]} : vector<2x128xf32> to vector<2x32xf32>
    %307 = arith.negf %306 : vector<2x32xf32>
    %308 = math.exp %307 : vector<2x32xf32>
    %cst_87 = arith.constant 1.000000e+00 : f32
    %309 = vector.broadcast %cst_87 : f32 to vector<2x32xf32>
    %310 = arith.addf %309, %308 : vector<2x32xf32>
    %311 = arith.divf %309, %310 : vector<2x32xf32>
    %312 = arith.mulf %303, %279 : vector<2x32xf32>
    %313 = arith.mulf %297, %305 : vector<2x32xf32>
    %314 = arith.addf %312, %313 : vector<2x32xf32>
    %315 = math.tanh %314 : vector<2x32xf32>
    %316 = arith.mulf %311, %315 : vector<2x32xf32>
    %317 = arith.index_cast %c7_i32 : i32 to index
    %c0_88 = arith.constant 0 : index
    %c0_89 = arith.constant 0 : index
    %318 = vector.load %arg5[%317, %c0_88, %c0_89] : memref<8x2x32xf32, #tpu.memory_space<vmem>>, vector<1x2x32xf32>
    %319 = vector.shape_cast %318 : vector<1x2x32xf32> to vector<2x32xf32>
    %320 = vector.shape_cast %316 : vector<2x32xf32> to vector<1x2x32xf32>
    tpu.vector_store %arg5[%317, %c0_88, %c0_89], %320 {strides = array<i32>} : memref<8x2x32xf32, #tpu.memory_space<vmem>>, vector<1x2x32xf32>,
    %c8_i32 = arith.constant 8 : i32
    return
  }
  func.func @transform_0(%arg0: i32) -> (i32, i32) {
    %c0_i32 = arith.constant 0 : i32
    %c0_i32_0 = arith.constant 0 : i32
    %c0_i32_1 = arith.constant 0 : i32
    return %c0_i32, %c0_i32_0 : i32, i32
  }
  func.func @transform_1(%arg0: i32) -> (i32, i32) {
    %c0_i32 = arith.constant 0 : i32
    %c0_i32_0 = arith.constant 0 : i32
    %c0_i32_1 = arith.constant 0 : i32
    return %c0_i32, %c0_i32_0 : i32, i32
  }
  func.func @transform_2(%arg0: i32) -> (i32, i32) {
    %c0_i32 = arith.constant 0 : i32
    %c0_i32_0 = arith.constant 0 : i32
    %c0_i32_1 = arith.constant 0 : i32
    return %c0_i32, %c0_i32_0 : i32, i32
  }
  func.func @transform_3(%arg0: i32) -> (i32, i32) {
    %c0_i32 = arith.constant 0 : i32
    %c0_i32_0 = arith.constant 0 : i32
    %c0_i32_1 = arith.constant 0 : i32
    return %c0_i32, %c0_i32_0 : i32, i32
  }
  func.func @transform_4(%arg0: i32) -> (i32, i32, i32) {
    %c0_i32 = arith.constant 0 : i32
    %c0_i32_0 = arith.constant 0 : i32
    %c0_i32_1 = arith.constant 0 : i32
    %c0_i32_2 = arith.constant 0 : i32
    return %c0_i32, %c0_i32_0, %c0_i32_1 : i32, i32, i32
  }
}

module attributes {stable_mosaic.version = 11 : i64} {
  func.func @crf_kernel(%arg0: i32, %arg1: memref<16x32xbf16, #tpu.memory_space<vmem>>, %arg2: memref<32x5xbf16, #tpu.memory_space<vmem>>, %arg3: memref<1x5xf32, #tpu.memory_space<vmem>>, %arg4: memref<5x5xf32, #tpu.memory_space<vmem>>, %arg5: memref<1x5xf32, #tpu.memory_space<vmem>>, %arg6: memref<1x5xf32, #tpu.memory_space<vmem>>, %arg7: memref<16x5xf32, #tpu.memory_space<vmem>>, %arg8: memref<8x2x1xf32, #tpu.memory_space<vmem>>, %arg9: memref<2x1xf32, #tpu.memory_space<vmem>>, %arg10: memref<1x1xf32, #tpu.memory_space<vmem>>, %arg11: memref<8x2x5xf32, #tpu.memory_space<vmem>>) attributes {dimension_semantics = [#tpu.dimension_semantics<arbitrary>], iteration_bounds = array<i64: 1>, scalar_prefetch = 0 : i64, scratch_operands = 1 : i64, tpu.core_type = #tpu.core_type<tc>, window_params = [{pipeline_mode = #tpu.pipeline_mode<synchronous>, transform_indices = @transform_0, window_bounds = array<i64: 16, 32>}, {pipeline_mode = #tpu.pipeline_mode<synchronous>, transform_indices = @transform_1, window_bounds = array<i64: 32, 5>}, {pipeline_mode = #tpu.pipeline_mode<synchronous>, transform_indices = @transform_2, window_bounds = array<i64: 1, 5>}, {pipeline_mode = #tpu.pipeline_mode<synchronous>, transform_indices = @transform_3, window_bounds = array<i64: 5, 5>}, {pipeline_mode = #tpu.pipeline_mode<synchronous>, transform_indices = @transform_4, window_bounds = array<i64: 1, 5>}, {pipeline_mode = #tpu.pipeline_mode<synchronous>, transform_indices = @transform_5, window_bounds = array<i64: 1, 5>}, {pipeline_mode = #tpu.pipeline_mode<synchronous>, transform_indices = @transform_6, window_bounds = array<i64: 16, 5>}, {pipeline_mode = #tpu.pipeline_mode<synchronous>, transform_indices = @transform_7, window_bounds = array<i64: 8, 2, 1>}, {pipeline_mode = #tpu.pipeline_mode<synchronous>, transform_indices = @transform_8, window_bounds = array<i64: 2, 1>}, {pipeline_mode = #tpu.pipeline_mode<synchronous>, transform_indices = @transform_9, window_bounds = array<i64: 1, 1>}]} {
    %c0 = arith.constant 0 : index
    %c0_0 = arith.constant 0 : index
    %0 = vector.load %arg1[%c0, %c0_0] : memref<16x32xbf16, #tpu.memory_space<vmem>>, vector<16x32xbf16>
    %c0_1 = arith.constant 0 : index
    %c0_2 = arith.constant 0 : index
    %1 = vector.load %arg2[%c0_1, %c0_2] : memref<32x5xbf16, #tpu.memory_space<vmem>>, vector<32x5xbf16>
    %cst = arith.constant dense<0.000000e+00> : vector<16x5xf32>
    %2 = tpu.matmul %0, %1, %cst {dimension_numbers = #tpu.dot_dimension_numbers<[1], [0], [0], [1], [0, 0, 1, 1], [], []>} : vector<16x32xbf16>, vector<32x5xbf16>, vector<16x5xf32> -> vector<16x5xf32>
    %c0_3 = arith.constant 0 : index
    %c0_4 = arith.constant 0 : index
    %3 = vector.load %arg3[%c0_3, %c0_4] : memref<1x5xf32, #tpu.memory_space<vmem>>, vector<1x5xf32>
    %4 = vector.broadcast %3 : vector<1x5xf32> to vector<16x5xf32>
    %5 = arith.addf %2, %4 : vector<16x5xf32>
    %c0_5 = arith.constant 0 : index
    %c0_6 = arith.constant 0 : index
    %6 = vector.load %arg7[%c0_5, %c0_6] : memref<16x5xf32, #tpu.memory_space<vmem>>, vector<16x5xf32>
    %7 = arith.mulf %6, %5 : vector<16x5xf32>
    %8 = vector.shape_cast %7 : vector<16x5xf32> to vector<1x16x5xf32>
    %cst_7 = arith.constant dense<0.000000e+00> : vector<1xf32>
    %9 = vector.multi_reduction <add>, %8, %cst_7 [1, 2] : vector<1x16x5xf32> to vector<1xf32>
    %10 = vector.shape_cast %9 : vector<1xf32> to vector<1x1x1xf32>
    %11 = vector.extract %10[0, 0, 0] : f32 from vector<1x1x1xf32>
    %12 = vector.broadcast %11 : f32 to vector<1x1xf32>
    %c0_8 = arith.constant 0 : index
    %c0_9 = arith.constant 0 : index
    %13 = vector.load %arg10[%c0_8, %c0_9] : memref<1x1xf32, #tpu.memory_space<vmem>>, vector<1x1xf32>
    tpu.vector_store %arg10[%c0_8, %c0_9], %12 {strides = array<i32>} : memref<1x1xf32, #tpu.memory_space<vmem>>, vector<1x1xf32>,
    %14 = vector.extract_strided_slice %5 {offsets = [0, 0], sizes = [2, 5], strides = [1, 1]} : vector<16x5xf32> to vector<2x5xf32>
    %c0_10 = arith.constant 0 : index
    %c0_11 = arith.constant 0 : index
    %c0_12 = arith.constant 0 : index
    %15 = vector.load %arg11[%c0_10, %c0_11, %c0_12] : memref<8x2x5xf32, #tpu.memory_space<vmem>>, vector<1x2x5xf32>
    %16 = vector.shape_cast %15 : vector<1x2x5xf32> to vector<2x5xf32>
    %17 = vector.shape_cast %14 : vector<2x5xf32> to vector<1x2x5xf32>
    tpu.vector_store %arg11[%c0_10, %c0_11, %c0_12], %17 {strides = array<i32>} : memref<8x2x5xf32, #tpu.memory_space<vmem>>, vector<1x2x5xf32>,
    %18 = vector.extract_strided_slice %5 {offsets = [2, 0], sizes = [2, 5], strides = [1, 1]} : vector<16x5xf32> to vector<2x5xf32>
    %c1 = arith.constant 1 : index
    %c0_13 = arith.constant 0 : index
    %c0_14 = arith.constant 0 : index
    %19 = vector.load %arg11[%c1, %c0_13, %c0_14] : memref<8x2x5xf32, #tpu.memory_space<vmem>>, vector<1x2x5xf32>
    %20 = vector.shape_cast %19 : vector<1x2x5xf32> to vector<2x5xf32>
    %21 = vector.shape_cast %18 : vector<2x5xf32> to vector<1x2x5xf32>
    tpu.vector_store %arg11[%c1, %c0_13, %c0_14], %21 {strides = array<i32>} : memref<8x2x5xf32, #tpu.memory_space<vmem>>, vector<1x2x5xf32>,
    %22 = vector.extract_strided_slice %5 {offsets = [4, 0], sizes = [2, 5], strides = [1, 1]} : vector<16x5xf32> to vector<2x5xf32>
    %c2 = arith.constant 2 : index
    %c0_15 = arith.constant 0 : index
    %c0_16 = arith.constant 0 : index
    %23 = vector.load %arg11[%c2, %c0_15, %c0_16] : memref<8x2x5xf32, #tpu.memory_space<vmem>>, vector<1x2x5xf32>
    %24 = vector.shape_cast %23 : vector<1x2x5xf32> to vector<2x5xf32>
    %25 = vector.shape_cast %22 : vector<2x5xf32> to vector<1x2x5xf32>
    tpu.vector_store %arg11[%c2, %c0_15, %c0_16], %25 {strides = array<i32>} : memref<8x2x5xf32, #tpu.memory_space<vmem>>, vector<1x2x5xf32>,
    %26 = vector.extract_strided_slice %5 {offsets = [6, 0], sizes = [2, 5], strides = [1, 1]} : vector<16x5xf32> to vector<2x5xf32>
    %c3 = arith.constant 3 : index
    %c0_17 = arith.constant 0 : index
    %c0_18 = arith.constant 0 : index
    %27 = vector.load %arg11[%c3, %c0_17, %c0_18] : memref<8x2x5xf32, #tpu.memory_space<vmem>>, vector<1x2x5xf32>
    %28 = vector.shape_cast %27 : vector<1x2x5xf32> to vector<2x5xf32>
    %29 = vector.shape_cast %26 : vector<2x5xf32> to vector<1x2x5xf32>
    tpu.vector_store %arg11[%c3, %c0_17, %c0_18], %29 {strides = array<i32>} : memref<8x2x5xf32, #tpu.memory_space<vmem>>, vector<1x2x5xf32>,
    %30 = vector.extract_strided_slice %5 {offsets = [8, 0], sizes = [2, 5], strides = [1, 1]} : vector<16x5xf32> to vector<2x5xf32>
    %c4 = arith.constant 4 : index
    %c0_19 = arith.constant 0 : index
    %c0_20 = arith.constant 0 : index
    %31 = vector.load %arg11[%c4, %c0_19, %c0_20] : memref<8x2x5xf32, #tpu.memory_space<vmem>>, vector<1x2x5xf32>
    %32 = vector.shape_cast %31 : vector<1x2x5xf32> to vector<2x5xf32>
    %33 = vector.shape_cast %30 : vector<2x5xf32> to vector<1x2x5xf32>
    tpu.vector_store %arg11[%c4, %c0_19, %c0_20], %33 {strides = array<i32>} : memref<8x2x5xf32, #tpu.memory_space<vmem>>, vector<1x2x5xf32>,
    %34 = vector.extract_strided_slice %5 {offsets = [10, 0], sizes = [2, 5], strides = [1, 1]} : vector<16x5xf32> to vector<2x5xf32>
    %c5 = arith.constant 5 : index
    %c0_21 = arith.constant 0 : index
    %c0_22 = arith.constant 0 : index
    %35 = vector.load %arg11[%c5, %c0_21, %c0_22] : memref<8x2x5xf32, #tpu.memory_space<vmem>>, vector<1x2x5xf32>
    %36 = vector.shape_cast %35 : vector<1x2x5xf32> to vector<2x5xf32>
    %37 = vector.shape_cast %34 : vector<2x5xf32> to vector<1x2x5xf32>
    tpu.vector_store %arg11[%c5, %c0_21, %c0_22], %37 {strides = array<i32>} : memref<8x2x5xf32, #tpu.memory_space<vmem>>, vector<1x2x5xf32>,
    %38 = vector.extract_strided_slice %5 {offsets = [12, 0], sizes = [2, 5], strides = [1, 1]} : vector<16x5xf32> to vector<2x5xf32>
    %c6 = arith.constant 6 : index
    %c0_23 = arith.constant 0 : index
    %c0_24 = arith.constant 0 : index
    %39 = vector.load %arg11[%c6, %c0_23, %c0_24] : memref<8x2x5xf32, #tpu.memory_space<vmem>>, vector<1x2x5xf32>
    %40 = vector.shape_cast %39 : vector<1x2x5xf32> to vector<2x5xf32>
    %41 = vector.shape_cast %38 : vector<2x5xf32> to vector<1x2x5xf32>
    tpu.vector_store %arg11[%c6, %c0_23, %c0_24], %41 {strides = array<i32>} : memref<8x2x5xf32, #tpu.memory_space<vmem>>, vector<1x2x5xf32>,
    %42 = vector.extract_strided_slice %5 {offsets = [14, 0], sizes = [2, 5], strides = [1, 1]} : vector<16x5xf32> to vector<2x5xf32>
    %c7 = arith.constant 7 : index
    %c0_25 = arith.constant 0 : index
    %c0_26 = arith.constant 0 : index
    %43 = vector.load %arg11[%c7, %c0_25, %c0_26] : memref<8x2x5xf32, #tpu.memory_space<vmem>>, vector<1x2x5xf32>
    %44 = vector.shape_cast %43 : vector<1x2x5xf32> to vector<2x5xf32>
    %45 = vector.shape_cast %42 : vector<2x5xf32> to vector<1x2x5xf32>
    tpu.vector_store %arg11[%c7, %c0_25, %c0_26], %45 {strides = array<i32>} : memref<8x2x5xf32, #tpu.memory_space<vmem>>, vector<1x2x5xf32>,
    %c0_27 = arith.constant 0 : index
    %c0_28 = arith.constant 0 : index
    %46 = vector.load %arg4[%c0_27, %c0_28] : memref<5x5xf32, #tpu.memory_space<vmem>>, vector<5x5xf32>
    %c0_29 = arith.constant 0 : index
    %c0_30 = arith.constant 0 : index
    %c0_31 = arith.constant 0 : index
    %47 = vector.load %arg11[%c0_29, %c0_30, %c0_31] : memref<8x2x5xf32, #tpu.memory_space<vmem>>, vector<1x2x5xf32>
    %48 = vector.shape_cast %47 : vector<1x2x5xf32> to vector<2x5xf32>
    %c0_32 = arith.constant 0 : index
    %c0_33 = arith.constant 0 : index
    %49 = vector.load %arg5[%c0_32, %c0_33] : memref<1x5xf32, #tpu.memory_space<vmem>>, vector<1x5xf32>
    %50 = vector.broadcast %49 : vector<1x5xf32> to vector<2x5xf32>
    %51 = arith.addf %48, %50 : vector<2x5xf32>
    %c1_i32 = arith.constant 1 : i32
    %52 = vector.shape_cast %51 : vector<2x5xf32> to vector<2x1x5xf32>
    %53 = vector.shape_cast %46 : vector<5x5xf32> to vector<1x5x5xf32>
    %54 = vector.broadcast %52 : vector<2x1x5xf32> to vector<2x5x5xf32>
    %55 = vector.broadcast %53 : vector<1x5x5xf32> to vector<2x5x5xf32>
    %56 = arith.addf %54, %55 : vector<2x5x5xf32>
    %cst_34 = arith.constant dense<0xFF800000> : vector<2x5xf32>
    %57 = vector.multi_reduction <maximumf>, %56, %cst_34 [2] : vector<2x5x5xf32> to vector<2x5xf32>
    %58 = vector.shape_cast %57 : vector<2x5xf32> to vector<2x5x1xf32>
    %59 = vector.broadcast %58 : vector<2x5x1xf32> to vector<2x5x5xf32>
    %60 = arith.subf %56, %59 : vector<2x5x5xf32>
    %61 = math.exp %60 : vector<2x5x5xf32>
    %cst_35 = arith.constant dense<0.000000e+00> : vector<2x5xf32>
    %62 = vector.multi_reduction <add>, %61, %cst_35 [2] : vector<2x5x5xf32> to vector<2x5xf32>
    %63 = math.log %62 : vector<2x5xf32>
    %64 = arith.addf %57, %63 : vector<2x5xf32>
    %65 = arith.index_cast %c1_i32 : i32 to index
    %c0_36 = arith.constant 0 : index
    %c0_37 = arith.constant 0 : index
    %66 = vector.load %arg11[%65, %c0_36, %c0_37] : memref<8x2x5xf32, #tpu.memory_space<vmem>>, vector<1x2x5xf32>
    %67 = vector.shape_cast %66 : vector<1x2x5xf32> to vector<2x5xf32>
    %68 = arith.addf %67, %64 : vector<2x5xf32>
    %69 = arith.index_cast %c1_i32 : i32 to index
    %c0_38 = arith.constant 0 : index
    %c0_39 = arith.constant 0 : index
    %70 = vector.load %arg8[%69, %c0_38, %c0_39] : memref<8x2x1xf32, #tpu.memory_space<vmem>>, vector<1x2x1xf32>
    %71 = vector.shape_cast %70 : vector<1x2x1xf32> to vector<2x1xf32>
    %72 = vector.broadcast %71 : vector<2x1xf32> to vector<2x5xf32>
    %73 = arith.mulf %72, %68 : vector<2x5xf32>
    %cst_40 = arith.constant 1.000000e+00 : f32
    %74 = vector.broadcast %cst_40 : f32 to vector<2x1xf32>
    %75 = arith.subf %74, %71 : vector<2x1xf32>
    %76 = vector.broadcast %75 : vector<2x1xf32> to vector<2x5xf32>
    %77 = arith.mulf %76, %51 : vector<2x5xf32>
    %78 = arith.addf %73, %77 : vector<2x5xf32>
    %c2_i32 = arith.constant 2 : i32
    %79 = vector.shape_cast %78 : vector<2x5xf32> to vector<2x1x5xf32>
    %80 = vector.shape_cast %46 : vector<5x5xf32> to vector<1x5x5xf32>
    %81 = vector.broadcast %79 : vector<2x1x5xf32> to vector<2x5x5xf32>
    %82 = vector.broadcast %80 : vector<1x5x5xf32> to vector<2x5x5xf32>
    %83 = arith.addf %81, %82 : vector<2x5x5xf32>
    %cst_41 = arith.constant dense<0xFF800000> : vector<2x5xf32>
    %84 = vector.multi_reduction <maximumf>, %83, %cst_41 [2] : vector<2x5x5xf32> to vector<2x5xf32>
    %85 = vector.shape_cast %84 : vector<2x5xf32> to vector<2x5x1xf32>
    %86 = vector.broadcast %85 : vector<2x5x1xf32> to vector<2x5x5xf32>
    %87 = arith.subf %83, %86 : vector<2x5x5xf32>
    %88 = math.exp %87 : vector<2x5x5xf32>
    %cst_42 = arith.constant dense<0.000000e+00> : vector<2x5xf32>
    %89 = vector.multi_reduction <add>, %88, %cst_42 [2] : vector<2x5x5xf32> to vector<2x5xf32>
    %90 = math.log %89 : vector<2x5xf32>
    %91 = arith.addf %84, %90 : vector<2x5xf32>
    %92 = arith.index_cast %c2_i32 : i32 to index
    %c0_43 = arith.constant 0 : index
    %c0_44 = arith.constant 0 : index
    %93 = vector.load %arg11[%92, %c0_43, %c0_44] : memref<8x2x5xf32, #tpu.memory_space<vmem>>, vector<1x2x5xf32>
    %94 = vector.shape_cast %93 : vector<1x2x5xf32> to vector<2x5xf32>
    %95 = arith.addf %94, %91 : vector<2x5xf32>
    %96 = arith.index_cast %c2_i32 : i32 to index
    %c0_45 = arith.constant 0 : index
    %c0_46 = arith.constant 0 : index
    %97 = vector.load %arg8[%96, %c0_45, %c0_46] : memref<8x2x1xf32, #tpu.memory_space<vmem>>, vector<1x2x1xf32>
    %98 = vector.shape_cast %97 : vector<1x2x1xf32> to vector<2x1xf32>
    %99 = vector.broadcast %98 : vector<2x1xf32> to vector<2x5xf32>
    %100 = arith.mulf %99, %95 : vector<2x5xf32>
    %cst_47 = arith.constant 1.000000e+00 : f32
    %101 = vector.broadcast %cst_47 : f32 to vector<2x1xf32>
    %102 = arith.subf %101, %98 : vector<2x1xf32>
    %103 = vector.broadcast %102 : vector<2x1xf32> to vector<2x5xf32>
    %104 = arith.mulf %103, %78 : vector<2x5xf32>
    %105 = arith.addf %100, %104 : vector<2x5xf32>
    %c3_i32 = arith.constant 3 : i32
    %106 = vector.shape_cast %105 : vector<2x5xf32> to vector<2x1x5xf32>
    %107 = vector.shape_cast %46 : vector<5x5xf32> to vector<1x5x5xf32>
    %108 = vector.broadcast %106 : vector<2x1x5xf32> to vector<2x5x5xf32>
    %109 = vector.broadcast %107 : vector<1x5x5xf32> to vector<2x5x5xf32>
    %110 = arith.addf %108, %109 : vector<2x5x5xf32>
    %cst_48 = arith.constant dense<0xFF800000> : vector<2x5xf32>
    %111 = vector.multi_reduction <maximumf>, %110, %cst_48 [2] : vector<2x5x5xf32> to vector<2x5xf32>
    %112 = vector.shape_cast %111 : vector<2x5xf32> to vector<2x5x1xf32>
    %113 = vector.broadcast %112 : vector<2x5x1xf32> to vector<2x5x5xf32>
    %114 = arith.subf %110, %113 : vector<2x5x5xf32>
    %115 = math.exp %114 : vector<2x5x5xf32>
    %cst_49 = arith.constant dense<0.000000e+00> : vector<2x5xf32>
    %116 = vector.multi_reduction <add>, %115, %cst_49 [2] : vector<2x5x5xf32> to vector<2x5xf32>
    %117 = math.log %116 : vector<2x5xf32>
    %118 = arith.addf %111, %117 : vector<2x5xf32>
    %119 = arith.index_cast %c3_i32 : i32 to index
    %c0_50 = arith.constant 0 : index
    %c0_51 = arith.constant 0 : index
    %120 = vector.load %arg11[%119, %c0_50, %c0_51] : memref<8x2x5xf32, #tpu.memory_space<vmem>>, vector<1x2x5xf32>
    %121 = vector.shape_cast %120 : vector<1x2x5xf32> to vector<2x5xf32>
    %122 = arith.addf %121, %118 : vector<2x5xf32>
    %123 = arith.index_cast %c3_i32 : i32 to index
    %c0_52 = arith.constant 0 : index
    %c0_53 = arith.constant 0 : index
    %124 = vector.load %arg8[%123, %c0_52, %c0_53] : memref<8x2x1xf32, #tpu.memory_space<vmem>>, vector<1x2x1xf32>
    %125 = vector.shape_cast %124 : vector<1x2x1xf32> to vector<2x1xf32>
    %126 = vector.broadcast %125 : vector<2x1xf32> to vector<2x5xf32>
    %127 = arith.mulf %126, %122 : vector<2x5xf32>
    %cst_54 = arith.constant 1.000000e+00 : f32
    %128 = vector.broadcast %cst_54 : f32 to vector<2x1xf32>
    %129 = arith.subf %128, %125 : vector<2x1xf32>
    %130 = vector.broadcast %129 : vector<2x1xf32> to vector<2x5xf32>
    %131 = arith.mulf %130, %105 : vector<2x5xf32>
    %132 = arith.addf %127, %131 : vector<2x5xf32>
    %c4_i32 = arith.constant 4 : i32
    %133 = vector.shape_cast %132 : vector<2x5xf32> to vector<2x1x5xf32>
    %134 = vector.shape_cast %46 : vector<5x5xf32> to vector<1x5x5xf32>
    %135 = vector.broadcast %133 : vector<2x1x5xf32> to vector<2x5x5xf32>
    %136 = vector.broadcast %134 : vector<1x5x5xf32> to vector<2x5x5xf32>
    %137 = arith.addf %135, %136 : vector<2x5x5xf32>
    %cst_55 = arith.constant dense<0xFF800000> : vector<2x5xf32>
    %138 = vector.multi_reduction <maximumf>, %137, %cst_55 [2] : vector<2x5x5xf32> to vector<2x5xf32>
    %139 = vector.shape_cast %138 : vector<2x5xf32> to vector<2x5x1xf32>
    %140 = vector.broadcast %139 : vector<2x5x1xf32> to vector<2x5x5xf32>
    %141 = arith.subf %137, %140 : vector<2x5x5xf32>
    %142 = math.exp %141 : vector<2x5x5xf32>
    %cst_56 = arith.constant dense<0.000000e+00> : vector<2x5xf32>
    %143 = vector.multi_reduction <add>, %142, %cst_56 [2] : vector<2x5x5xf32> to vector<2x5xf32>
    %144 = math.log %143 : vector<2x5xf32>
    %145 = arith.addf %138, %144 : vector<2x5xf32>
    %146 = arith.index_cast %c4_i32 : i32 to index
    %c0_57 = arith.constant 0 : index
    %c0_58 = arith.constant 0 : index
    %147 = vector.load %arg11[%146, %c0_57, %c0_58] : memref<8x2x5xf32, #tpu.memory_space<vmem>>, vector<1x2x5xf32>
    %148 = vector.shape_cast %147 : vector<1x2x5xf32> to vector<2x5xf32>
    %149 = arith.addf %148, %145 : vector<2x5xf32>
    %150 = arith.index_cast %c4_i32 : i32 to index
    %c0_59 = arith.constant 0 : index
    %c0_60 = arith.constant 0 : index
    %151 = vector.load %arg8[%150, %c0_59, %c0_60] : memref<8x2x1xf32, #tpu.memory_space<vmem>>, vector<1x2x1xf32>
    %152 = vector.shape_cast %151 : vector<1x2x1xf32> to vector<2x1xf32>
    %153 = vector.broadcast %152 : vector<2x1xf32> to vector<2x5xf32>
    %154 = arith.mulf %153, %149 : vector<2x5xf32>
    %cst_61 = arith.constant 1.000000e+00 : f32
    %155 = vector.broadcast %cst_61 : f32 to vector<2x1xf32>
    %156 = arith.subf %155, %152 : vector<2x1xf32>
    %157 = vector.broadcast %156 : vector<2x1xf32> to vector<2x5xf32>
    %158 = arith.mulf %157, %132 : vector<2x5xf32>
    %159 = arith.addf %154, %158 : vector<2x5xf32>
    %c5_i32 = arith.constant 5 : i32
    %160 = vector.shape_cast %159 : vector<2x5xf32> to vector<2x1x5xf32>
    %161 = vector.shape_cast %46 : vector<5x5xf32> to vector<1x5x5xf32>
    %162 = vector.broadcast %160 : vector<2x1x5xf32> to vector<2x5x5xf32>
    %163 = vector.broadcast %161 : vector<1x5x5xf32> to vector<2x5x5xf32>
    %164 = arith.addf %162, %163 : vector<2x5x5xf32>
    %cst_62 = arith.constant dense<0xFF800000> : vector<2x5xf32>
    %165 = vector.multi_reduction <maximumf>, %164, %cst_62 [2] : vector<2x5x5xf32> to vector<2x5xf32>
    %166 = vector.shape_cast %165 : vector<2x5xf32> to vector<2x5x1xf32>
    %167 = vector.broadcast %166 : vector<2x5x1xf32> to vector<2x5x5xf32>
    %168 = arith.subf %164, %167 : vector<2x5x5xf32>
    %169 = math.exp %168 : vector<2x5x5xf32>
    %cst_63 = arith.constant dense<0.000000e+00> : vector<2x5xf32>
    %170 = vector.multi_reduction <add>, %169, %cst_63 [2] : vector<2x5x5xf32> to vector<2x5xf32>
    %171 = math.log %170 : vector<2x5xf32>
    %172 = arith.addf %165, %171 : vector<2x5xf32>
    %173 = arith.index_cast %c5_i32 : i32 to index
    %c0_64 = arith.constant 0 : index
    %c0_65 = arith.constant 0 : index
    %174 = vector.load %arg11[%173, %c0_64, %c0_65] : memref<8x2x5xf32, #tpu.memory_space<vmem>>, vector<1x2x5xf32>
    %175 = vector.shape_cast %174 : vector<1x2x5xf32> to vector<2x5xf32>
    %176 = arith.addf %175, %172 : vector<2x5xf32>
    %177 = arith.index_cast %c5_i32 : i32 to index
    %c0_66 = arith.constant 0 : index
    %c0_67 = arith.constant 0 : index
    %178 = vector.load %arg8[%177, %c0_66, %c0_67] : memref<8x2x1xf32, #tpu.memory_space<vmem>>, vector<1x2x1xf32>
    %179 = vector.shape_cast %178 : vector<1x2x1xf32> to vector<2x1xf32>
    %180 = vector.broadcast %179 : vector<2x1xf32> to vector<2x5xf32>
    %181 = arith.mulf %180, %176 : vector<2x5xf32>
    %cst_68 = arith.constant 1.000000e+00 : f32
    %182 = vector.broadcast %cst_68 : f32 to vector<2x1xf32>
    %183 = arith.subf %182, %179 : vector<2x1xf32>
    %184 = vector.broadcast %183 : vector<2x1xf32> to vector<2x5xf32>
    %185 = arith.mulf %184, %159 : vector<2x5xf32>
    %186 = arith.addf %181, %185 : vector<2x5xf32>
    %c6_i32 = arith.constant 6 : i32
    %187 = vector.shape_cast %186 : vector<2x5xf32> to vector<2x1x5xf32>
    %188 = vector.shape_cast %46 : vector<5x5xf32> to vector<1x5x5xf32>
    %189 = vector.broadcast %187 : vector<2x1x5xf32> to vector<2x5x5xf32>
    %190 = vector.broadcast %188 : vector<1x5x5xf32> to vector<2x5x5xf32>
    %191 = arith.addf %189, %190 : vector<2x5x5xf32>
    %cst_69 = arith.constant dense<0xFF800000> : vector<2x5xf32>
    %192 = vector.multi_reduction <maximumf>, %191, %cst_69 [2] : vector<2x5x5xf32> to vector<2x5xf32>
    %193 = vector.shape_cast %192 : vector<2x5xf32> to vector<2x5x1xf32>
    %194 = vector.broadcast %193 : vector<2x5x1xf32> to vector<2x5x5xf32>
    %195 = arith.subf %191, %194 : vector<2x5x5xf32>
    %196 = math.exp %195 : vector<2x5x5xf32>
    %cst_70 = arith.constant dense<0.000000e+00> : vector<2x5xf32>
    %197 = vector.multi_reduction <add>, %196, %cst_70 [2] : vector<2x5x5xf32> to vector<2x5xf32>
    %198 = math.log %197 : vector<2x5xf32>
    %199 = arith.addf %192, %198 : vector<2x5xf32>
    %200 = arith.index_cast %c6_i32 : i32 to index
    %c0_71 = arith.constant 0 : index
    %c0_72 = arith.constant 0 : index
    %201 = vector.load %arg11[%200, %c0_71, %c0_72] : memref<8x2x5xf32, #tpu.memory_space<vmem>>, vector<1x2x5xf32>
    %202 = vector.shape_cast %201 : vector<1x2x5xf32> to vector<2x5xf32>
    %203 = arith.addf %202, %199 : vector<2x5xf32>
    %204 = arith.index_cast %c6_i32 : i32 to index
    %c0_73 = arith.constant 0 : index
    %c0_74 = arith.constant 0 : index
    %205 = vector.load %arg8[%204, %c0_73, %c0_74] : memref<8x2x1xf32, #tpu.memory_space<vmem>>, vector<1x2x1xf32>
    %206 = vector.shape_cast %205 : vector<1x2x1xf32> to vector<2x1xf32>
    %207 = vector.broadcast %206 : vector<2x1xf32> to vector<2x5xf32>
    %208 = arith.mulf %207, %203 : vector<2x5xf32>
    %cst_75 = arith.constant 1.000000e+00 : f32
    %209 = vector.broadcast %cst_75 : f32 to vector<2x1xf32>
    %210 = arith.subf %209, %206 : vector<2x1xf32>
    %211 = vector.broadcast %210 : vector<2x1xf32> to vector<2x5xf32>
    %212 = arith.mulf %211, %186 : vector<2x5xf32>
    %213 = arith.addf %208, %212 : vector<2x5xf32>
    %c7_i32 = arith.constant 7 : i32
    %214 = vector.shape_cast %213 : vector<2x5xf32> to vector<2x1x5xf32>
    %215 = vector.shape_cast %46 : vector<5x5xf32> to vector<1x5x5xf32>
    %216 = vector.broadcast %214 : vector<2x1x5xf32> to vector<2x5x5xf32>
    %217 = vector.broadcast %215 : vector<1x5x5xf32> to vector<2x5x5xf32>
    %218 = arith.addf %216, %217 : vector<2x5x5xf32>
    %cst_76 = arith.constant dense<0xFF800000> : vector<2x5xf32>
    %219 = vector.multi_reduction <maximumf>, %218, %cst_76 [2] : vector<2x5x5xf32> to vector<2x5xf32>
    %220 = vector.shape_cast %219 : vector<2x5xf32> to vector<2x5x1xf32>
    %221 = vector.broadcast %220 : vector<2x5x1xf32> to vector<2x5x5xf32>
    %222 = arith.subf %218, %221 : vector<2x5x5xf32>
    %223 = math.exp %222 : vector<2x5x5xf32>
    %cst_77 = arith.constant dense<0.000000e+00> : vector<2x5xf32>
    %224 = vector.multi_reduction <add>, %223, %cst_77 [2] : vector<2x5x5xf32> to vector<2x5xf32>
    %225 = math.log %224 : vector<2x5xf32>
    %226 = arith.addf %219, %225 : vector<2x5xf32>
    %227 = arith.index_cast %c7_i32 : i32 to index
    %c0_78 = arith.constant 0 : index
    %c0_79 = arith.constant 0 : index
    %228 = vector.load %arg11[%227, %c0_78, %c0_79] : memref<8x2x5xf32, #tpu.memory_space<vmem>>, vector<1x2x5xf32>
    %229 = vector.shape_cast %228 : vector<1x2x5xf32> to vector<2x5xf32>
    %230 = arith.addf %229, %226 : vector<2x5xf32>
    %231 = arith.index_cast %c7_i32 : i32 to index
    %c0_80 = arith.constant 0 : index
    %c0_81 = arith.constant 0 : index
    %232 = vector.load %arg8[%231, %c0_80, %c0_81] : memref<8x2x1xf32, #tpu.memory_space<vmem>>, vector<1x2x1xf32>
    %233 = vector.shape_cast %232 : vector<1x2x1xf32> to vector<2x1xf32>
    %234 = vector.broadcast %233 : vector<2x1xf32> to vector<2x5xf32>
    %235 = arith.mulf %234, %230 : vector<2x5xf32>
    %cst_82 = arith.constant 1.000000e+00 : f32
    %236 = vector.broadcast %cst_82 : f32 to vector<2x1xf32>
    %237 = arith.subf %236, %233 : vector<2x1xf32>
    %238 = vector.broadcast %237 : vector<2x1xf32> to vector<2x5xf32>
    %239 = arith.mulf %238, %213 : vector<2x5xf32>
    %240 = arith.addf %235, %239 : vector<2x5xf32>
    %c7_i32_83 = arith.constant 7 : i32
    %c0_84 = arith.constant 0 : index
    %c0_85 = arith.constant 0 : index
    %241 = vector.load %arg6[%c0_84, %c0_85] : memref<1x5xf32, #tpu.memory_space<vmem>>, vector<1x5xf32>
    %242 = vector.broadcast %241 : vector<1x5xf32> to vector<2x5xf32>
    %243 = arith.addf %240, %242 : vector<2x5xf32>
    %cst_86 = arith.constant dense<0xFF800000> : vector<2xf32>
    %244 = vector.multi_reduction <maximumf>, %243, %cst_86 [1] : vector<2x5xf32> to vector<2xf32>
    %245 = vector.shape_cast %244 : vector<2xf32> to vector<2x1xf32>
    %246 = vector.broadcast %245 : vector<2x1xf32> to vector<2x5xf32>
    %247 = arith.subf %243, %246 : vector<2x5xf32>
    %248 = math.exp %247 : vector<2x5xf32>
    %cst_87 = arith.constant dense<0.000000e+00> : vector<2xf32>
    %249 = vector.multi_reduction <add>, %248, %cst_87 [1] : vector<2x5xf32> to vector<2xf32>
    %250 = vector.shape_cast %249 : vector<2xf32> to vector<2x1xf32>
    %251 = math.log %250 : vector<2x1xf32>
    %252 = arith.addf %245, %251 : vector<2x1xf32>
    %c0_88 = arith.constant 0 : index
    %c0_89 = arith.constant 0 : index
    %253 = vector.load %arg9[%c0_88, %c0_89] : memref<2x1xf32, #tpu.memory_space<vmem>>, vector<2x1xf32>
    tpu.vector_store %arg9[%c0_88, %c0_89], %252 {strides = array<i32>} : memref<2x1xf32, #tpu.memory_space<vmem>>, vector<2x1xf32>,
    return
  }
  func.func @transform_0(%arg0: i32) -> (i32, i32) {
    %c0_i32 = arith.constant 0 : i32
    %c0_i32_0 = arith.constant 0 : i32
    %c0_i32_1 = arith.constant 0 : i32
    return %c0_i32, %c0_i32_0 : i32, i32
  }
  func.func @transform_1(%arg0: i32) -> (i32, i32) {
    %c0_i32 = arith.constant 0 : i32
    %c0_i32_0 = arith.constant 0 : i32
    %c0_i32_1 = arith.constant 0 : i32
    return %c0_i32, %c0_i32_0 : i32, i32
  }
  func.func @transform_2(%arg0: i32) -> (i32, i32) {
    %c0_i32 = arith.constant 0 : i32
    %c0_i32_0 = arith.constant 0 : i32
    %c0_i32_1 = arith.constant 0 : i32
    return %c0_i32, %c0_i32_0 : i32, i32
  }
  func.func @transform_3(%arg0: i32) -> (i32, i32) {
    %c0_i32 = arith.constant 0 : i32
    %c0_i32_0 = arith.constant 0 : i32
    %c0_i32_1 = arith.constant 0 : i32
    return %c0_i32, %c0_i32_0 : i32, i32
  }
  func.func @transform_4(%arg0: i32) -> (i32, i32) {
    %c0_i32 = arith.constant 0 : i32
    %c0_i32_0 = arith.constant 0 : i32
    %c0_i32_1 = arith.constant 0 : i32
    return %c0_i32, %c0_i32_0 : i32, i32
  }
  func.func @transform_5(%arg0: i32) -> (i32, i32) {
    %c0_i32 = arith.constant 0 : i32
    %c0_i32_0 = arith.constant 0 : i32
    %c0_i32_1 = arith.constant 0 : i32
    return %c0_i32, %c0_i32_0 : i32, i32
  }
  func.func @transform_6(%arg0: i32) -> (i32, i32) {
    %c0_i32 = arith.constant 0 : i32
    %c0_i32_0 = arith.constant 0 : i32
    %c0_i32_1 = arith.constant 0 : i32
    return %c0_i32, %c0_i32_0 : i32, i32
  }
  func.func @transform_7(%arg0: i32) -> (i32, i32, i32) {
    %c0_i32 = arith.constant 0 : i32
    %c0_i32_0 = arith.constant 0 : i32
    %c0_i32_1 = arith.constant 0 : i32
    %c0_i32_2 = arith.constant 0 : i32
    return %c0_i32, %c0_i32_0, %c0_i32_1 : i32, i32, i32
  }
  func.func @transform_8(%arg0: i32) -> (i32, i32) {
    %c0_i32 = arith.constant 0 : i32
    %c0_i32_0 = arith.constant 0 : i32
    %c0_i32_1 = arith.constant 0 : i32
    return %c0_i32, %c0_i32_0 : i32, i32
  }
  func.func @transform_9(%arg0: i32) -> (i32, i32) {
    %c0_i32 = arith.constant 0 : i32
    %c0_i32_0 = arith.constant 0 : i32
    %c0_i32_1 = arith.constant 0 : i32
    return %c0_i32, %c0_i32_0 : i32, i32
  }
}

</mosaic_0001>

<bundles_post_ra>
// kernel: cnn_bilstm_crf_forward.2
= control target key start
LH: loop header
LB: loop body
LE: loop exit
PB: predicated region body
PF: predicated region fallthrough
CT: control target
= control target key end

     0   :  { %v757_v6 = vmov 0   ;;  %vm61_vm0 = vcmask 523264   ;;  %vm111_vm5 = vcmask 261120   ;;  %s917_s1 = inlined_call_operand.vmem [shape: bf16[64,128], index: 1, kind: input, shape index: {}]   ;;  %s918_s2 = inlined_call_operand.vmem [shape: bf16[32,128], index: 2, kind: input, shape index: {}]   ;;  %s919_s3 = inlined_call_operand.vmem [shape: f32[1,128], index: 3, kind: input, shape index: {}]   ;;  %s920_s0 = inlined_call_operand.vmem [shape: bf16[16,64], index: 0, kind: input, shape index: {}]   ;;  %s921_s4 = inlined_call_operand.vmem [shape: f32[8,2,32], index: 4, kind: output, shape index: {}]  }
   0x1   :  { %v686_v0 = vld [vmem:[%s917_s1 + $0x18] sm:$0xff]  ;;  %v688_v1 = vld [vmem:[%s918_s2 + $0x8] sm:$0xff]  ;;  %v685_v2 = vld [vmem:[%s917_s1 + $0x10] sm:$0xff] }
   0x2   :  { %69 = vmatpush.bf16.msra.mxu0 %v686_v0  ;;  %121 = vmatpush.bf16.msra.mxu1 %v688_v1  ;;  %v687_v3 = vld [vmem:[%s918_s2] sm:$0xff]  ;;  %v684_v4 = vld [vmem:[%s917_s1 + $0x8] sm:$0xff] }
   0x3   :  { %186 = vmatpush.bf16.msra.mxu2 %v688_v1  ;;  %251 = vmatpush.bf16.msra.mxu3 %v688_v1  ;;  %v683_v5 = vld [vmem:[%s917_s1] sm:$0xff]  ;;  %s759_s1 = smov 32  }
   0x4   :  { %v682_v7 = vld [vmem:[%s920_s0] sm:$0xff]  ;;  %s758_s0 = smov 64  }
   0x5   :  { %v692_v9 = vld [vmem:[%s919_s3] ss:$0 sm:$0xff] }
   0x6   :  { %70 = vmatpush.bf16.msra.mxu0 %v685_v2  ;;  %122 = vmatpush.bf16.msra.mxu1 %v687_v3 }
   0x7   :  { %187 = vmatpush.bf16.msra.mxu2 %v687_v3  ;;  %252 = vmatpush.bf16.msra.mxu3 %v687_v3 }
   0x9   :  { %123 = vmatmul.bf16.vlgmr.msra.gmra.mxu1 %v757_v6 }
   0xa   :  { %316 = vmatpush.bf16.msrb.mxu1 %v688_v1  ;;  %71 = vmatpush.bf16.msra.mxu0 %v684_v4 }
   0xb   :  { %381 = vmatpush.bf16.msrb.mxu2 %v688_v1  ;;  %446 = vmatpush.bf16.msrb.mxu3 %v688_v1 }
   0xe   :  { %317 = vmatpush.bf16.msrb.mxu1 %v687_v3  ;;  %72 = vmatpush.bf16.msra.mxu0 %v683_v5 }
   0xf   :  { %382 = vmatpush.bf16.msrb.mxu2 %v687_v3  ;;  %447 = vmatpush.bf16.msrb.mxu3 %v687_v3 }
  0x11   :  { %651 = vmatmul.msk.bf16.vlgmr.msra.gmra.mxu0 %vm61_vm0, %v682_v7 }
  0x12   :  { %576 = vmatpush.bf16.msra.mxu1 %v688_v1  ;;  %511 = vmatpush.bf16.msrb.mxu0 %v688_v1 }
  0x16   :  { %577 = vmatpush.bf16.msra.mxu1 %v687_v3  ;;  %512 = vmatpush.bf16.msrb.mxu0 %v687_v3 }
  0x86   :  { %v124_v8 = vpop.f32.mrf.mxu1 }
  0x8e   :  { %v74_v10 = vpop.f32.mrf.mxu0  ;;  %v126_v12 = vpop.f32.mrf.mxu1 }
  0x8f   :  { %v75_v11 = vadd.f32 %v692_v9, %v74_v10 }
  0x91   :  { %79 = vst [vmem:[#allocation2] sm:$0xf] %v75_v11  }
  0x92   :  { %83 = vst [vmem:[#allocation2] sm:$0xf0] %v75_v11  }
  0x96   :  { %v76_v13 = vpop.f32.mrf.mxu0 }
  0x97   :  { %v77_v14 = vadd.f32 %v692_v9, %v76_v13 }
  0x98   :  { %v98_v15 = vld [vmem:[#allocation2] sm:$0x3]  ;;  %v172_v41 = vld [vmem:[#allocation2 + $0x2] sm:$0x3] }
  0x99   :  { %v128_v16 = vadd.f32 %v124_v8, %v98_v15  ;;  %87 = vst [vmem:[#allocation2 + $0x8] sm:$0xf] %v77_v14   ;;  %v237_v5 = vld [vmem:[#allocation2 + $0x4] sm:$0x3] }
  0x9a   :  { %91 = vst [vmem:[#allocation2 + $0x8] sm:$0xf0] %v77_v14  }
  0x9b   :  { %693 = vtanh.f32 %v128_v16  ;;  %v660_v18 = vmul.f32 -1.442695, %v128_v16 }
  0x9d   :  { %695 = vpow2.f32 %v660_v18 }
  0xa1   :  { %v694_v17 = vpop.eup %693 }
  0xa2   :  { %151 = vrot.lane.b32.xlu0 %v694_v17, %s758_s0 }
  0xa3   :  { %v696_v19 = vpop.eup %695 }
  0xa4   :  { %v132_v20 = vadd.f32 1.0, %v696_v19 }
  0xa6   :  { %697 = vrcp.f32 %v132_v20  ;;  %v144_v26 = vand.u32 2147483648, %v132_v20  ;;  %vm138_vm2 = vweird.f32 %v132_v20  ;;  %v142_v27 = vand.u32 2147483647, %v132_v20 }
  0xa8   :  { %v145_v29 = vor.u32 1.1754944e-38, %v144_v26  ;;  %vm143_vm4 = vcmp.eq.f32.partialorder %v142_v27, 8.507059e+37 }
  0xac   :  { %v698_v21 = vpop.eup %697 }
  0xad   :  { %v134_v22 = vmul.f32 %v698_v21, %v132_v20  ;;  %vm139_vm1 = vweird.f32 %v698_v21 }
  0xae   :  { %vm140_vm3 = vmor %vm138_vm2, %vm139_vm1 }
  0xaf   :  { %v135_v23 = vsub.f32 1.0, %v134_v22 }
  0xb1   :  { %v136_v24 = vmul.f32 %v698_v21, %v135_v23 }
  0xb3   :  { %v137_v25 = vadd.f32 %v698_v21, %v136_v24 }
  0xb5   :  { %v141_v28 = vsel %vm140_vm3, %v698_v21, %v137_v25 }
  0xb6   :  { %v146_v31 = vsel %vm143_vm4, %v145_v29, %v141_v28 }
  0xb7   :  { %v149_v33 = vmul.f32 0.0, %v146_v31 }
 0x114   :  { %v152_v30 = vpop.permute.xlu0 %151 }
 0x115   :  { %v154_v32 = vmul.f32 %v152_v30, %v146_v31 }
 0x117   :  { %156 = vrot.lane.b32.xlu0 %v154_v32, %s759_s1 }
 0x189   :  { %v157_v34 = vpop.permute.xlu0 %156 }
 0x18a   :  { %v159_v35 = vadd.f32 %v157_v34, %v149_v33  ;;  %v302_v33 = vld [vmem:[#allocation2 + $0x6] sm:$0x3] }
 0x18c   :  { %699 = vtanh.f32 %v159_v35 }
 0x192   :  { %v700_v36 = vpop.eup %699 }
 0x193   :  { %162 = vrot.lane.b32.xlu1 %v700_v36, %s758_s0 }
 0x205   :  { %v163_v37 = vpop.permute.xlu1 %162 }
 0x206   :  { %v812_v38 = vmul.f32 %v163_v37, %v146_v31 }
 0x208   :  { %v173_v39 = vpack.c.bf16 %v812_v38, %v812_v38 }
 0x20a   :  { %175 = vrot.lane.b32.xlu1 %v173_v39, %s759_s1 }
 0x27c   :  { %v176_v40 = vpop.permute.xlu1 %175 }
 0x27d   :  { %661 = vmatmul.msk.bf16.vlgmr.msra.gmra.mxu2 %vm111_vm5, %v176_v40 }
 0x300   :  { %v189_v42 = vpop.f32.mrf.mxu2 }
 0x301   :  { %v193_v43 = vadd.f32 %v189_v42, %v172_v41 }
 0x303   :  { %701 = vtanh.f32 %v193_v43  ;;  %v662_v46 = vmul.f32 -1.442695, %v193_v43 }
 0x305   :  { %703 = vpow2.f32 %v662_v46 }
 0x308   :  { %v191_v44 = vpop.f32.mrf.mxu2 }
 0x309   :  { %v702_v45 = vpop.eup %701 }
 0x30a   :  { %216 = vrot.lane.b32.xlu2 %v702_v45, %s758_s0 }
 0x30b   :  { %v704_v47 = vpop.eup %703 }
 0x30c   :  { %v197_v48 = vadd.f32 1.0, %v704_v47 }
 0x30e   :  { %705 = vrcp.f32 %v197_v48  ;;  %v209_v54 = vand.u32 2147483648, %v197_v48  ;;  %vm203_vm7 = vweird.f32 %v197_v48  ;;  %v207_v55 = vand.u32 2147483647, %v197_v48 }
 0x310   :  { %v210_v57 = vor.u32 1.1754944e-38, %v209_v54  ;;  %vm208_vm9 = vcmp.eq.f32.partialorder %v207_v55, 8.507059e+37 }
 0x314   :  { %v706_v49 = vpop.eup %705 }
 0x315   :  { %v199_v50 = vmul.f32 %v706_v49, %v197_v48  ;;  %vm204_vm6 = vweird.f32 %v706_v49 }
 0x316   :  { %vm205_vm8 = vmor %vm203_vm7, %vm204_vm6 }
 0x317   :  { %v200_v51 = vsub.f32 1.0, %v199_v50 }
 0x319   :  { %v201_v52 = vmul.f32 %v706_v49, %v200_v51 }
 0x31b   :  { %v202_v53 = vadd.f32 %v706_v49, %v201_v52 }
 0x31d   :  { %v206_v56 = vsel %vm205_vm8, %v706_v49, %v202_v53 }
 0x31e   :  { %v211_v59 = vsel %vm208_vm9, %v210_v57, %v206_v56 }
 0x31f   :  { %v214_v61 = vmul.f32 %v211_v59, %v159_v35 }
 0x364   :  { %v217_v58 = vpop.permute.xlu2 %216 }
 0x365   :  { %v219_v60 = vmul.f32 %v217_v58, %v211_v59 }
 0x367   :  { %221 = vrot.lane.b32.xlu2 %v219_v60, %s759_s1 }
 0x3c1   :  { %v222_v62 = vpop.permute.xlu2 %221 }
 0x3c2   :  { %v224_v63 = vadd.f32 %v222_v62, %v214_v61  ;;  %v367_v62 = vld [vmem:[#allocation2 + $0x8] sm:$0x3] }
 0x3c4   :  { %707 = vtanh.f32 %v224_v63 }
 0x3ca   :  { %v708_v0 = vpop.eup %707 }
 0x3cb   :  { %227 = vrot.lane.b32.xlu0 %v708_v0, %s758_s0 }
 0x43d   :  { %v228_v1 = vpop.permute.xlu0 %227 }
 0x43e   :  { %v821_v2 = vmul.f32 %v228_v1, %v211_v59 }
 0x440   :  { %v238_v3 = vpack.c.bf16 %v821_v2, %v821_v2 }
 0x442   :  { %240 = vrot.lane.b32.xlu1 %v238_v3, %s759_s1 }
 0x4b4   :  { %v241_v4 = vpop.permute.xlu1 %240 }
 0x4b5   :  { %664 = vmatmul.msk.bf16.vlgmr.msra.gmra.mxu3 %vm111_vm5, %v241_v4 }
 0x538   :  { %v254_v6 = vpop.f32.mrf.mxu3 }
 0x539   :  { %v258_v7 = vadd.f32 %v254_v6, %v237_v5 }
 0x53b   :  { %709 = vtanh.f32 %v258_v7  ;;  %v665_v10 = vmul.f32 -1.442695, %v258_v7 }
 0x53d   :  { %711 = vpow2.f32 %v665_v10 }
 0x540   :  { %v256_v8 = vpop.f32.mrf.mxu3 }
 0x541   :  { %v710_v9 = vpop.eup %709 }
 0x542   :  { %281 = vrot.lane.b32.xlu2 %v710_v9, %s758_s0 }
 0x543   :  { %v712_v11 = vpop.eup %711 }
 0x544   :  { %v262_v12 = vadd.f32 1.0, %v712_v11 }
 0x546   :  { %713 = vrcp.f32 %v262_v12  ;;  %v274_v18 = vand.u32 2147483648, %v262_v12  ;;  %vm268_vm11 = vweird.f32 %v262_v12  ;;  %v272_v19 = vand.u32 2147483647, %v262_v12 }
 0x548   :  { %v275_v21 = vor.u32 1.1754944e-38, %v274_v18  ;;  %vm273_vm13 = vcmp.eq.f32.partialorder %v272_v19, 8.507059e+37 }
 0x54c   :  { %v714_v13 = vpop.eup %713 }
 0x54d   :  { %v264_v14 = vmul.f32 %v714_v13, %v262_v12  ;;  %vm269_vm10 = vweird.f32 %v714_v13 }
 0x54e   :  { %vm270_vm12 = vmor %vm268_vm11, %vm269_vm10 }
 0x54f   :  { %v265_v15 = vsub.f32 1.0, %v264_v14 }
 0x551   :  { %v266_v16 = vmul.f32 %v714_v13, %v265_v15 }
 0x553   :  { %v267_v17 = vadd.f32 %v714_v13, %v266_v16 }
 0x555   :  { %v271_v20 = vsel %vm270_vm12, %v714_v13, %v267_v17 }
 0x556   :  { %v276_v23 = vsel %vm273_vm13, %v275_v21, %v271_v20 }
 0x557   :  { %v279_v25 = vmul.f32 %v276_v23, %v224_v63 }
 0x59c   :  { %v282_v22 = vpop.permute.xlu2 %281 }
 0x59d   :  { %v284_v24 = vmul.f32 %v282_v22, %v276_v23 }
 0x59f   :  { %286 = vrot.lane.b32.xlu0 %v284_v24, %s759_s1 }
 0x611   :  { %v287_v26 = vpop.permute.xlu0 %286 }
 0x612   :  { %v289_v27 = vadd.f32 %v287_v26, %v279_v25 }
 0x614   :  { %715 = vtanh.f32 %v289_v27 }
 0x61a   :  { %v716_v28 = vpop.eup %715 }
 0x61b   :  { %292 = vrot.lane.b32.xlu1 %v716_v28, %s758_s0 }
 0x68d   :  { %v293_v29 = vpop.permute.xlu1 %292 }
 0x68e   :  { %v830_v30 = vmul.f32 %v293_v29, %v276_v23 }
 0x690   :  { %v303_v31 = vpack.c.bf16 %v830_v30, %v830_v30 }
 0x692   :  { %305 = vrot.lane.b32.xlu2 %v303_v31, %s759_s1 }
 0x6ec   :  { %v306_v32 = vpop.permute.xlu2 %305 }
 0x6ed   :  { %667 = vmatmul.msk.bf16.vlgmr.msrb.gmra.mxu1 %vm111_vm5, %v306_v32 }
 0x76a   :  { %v319_v34 = vpop.f32.mrf.mxu1 }
 0x76b   :  { %v323_v35 = vadd.f32 %v319_v34, %v302_v33 }
 0x76d   :  { %717 = vtanh.f32 %v323_v35  ;;  %v668_v39 = vmul.f32 -1.442695, %v323_v35 }
 0x76f   :  { %719 = vpow2.f32 %v668_v39 }
 0x772   :  { %v321_v36 = vpop.f32.mrf.mxu1 }
 0x773   :  { %v718_v37 = vpop.eup %717 }
 0x774   :  { %346 = vrot.lane.b32.xlu0 %v718_v37, %s758_s0 }
 0x775   :  { %v720_v40 = vpop.eup %719 }
 0x776   :  { %v327_v41 = vadd.f32 1.0, %v720_v40 }
 0x778   :  { %721 = vrcp.f32 %v327_v41  ;;  %v339_v47 = vand.u32 2147483648, %v327_v41  ;;  %vm333_vm15 = vweird.f32 %v327_v41  ;;  %v337_v48 = vand.u32 2147483647, %v327_v41 }
 0x77a   :  { %v340_v50 = vor.u32 1.1754944e-38, %v339_v47  ;;  %vm338_vm1 = vcmp.eq.f32.partialorder %v337_v48, 8.507059e+37 }
 0x77e   :  { %v722_v42 = vpop.eup %721 }
 0x77f   :  { %v329_v43 = vmul.f32 %v722_v42, %v327_v41  ;;  %vm334_vm14 = vweird.f32 %v722_v42 }
 0x780   :  { %vm335_vm0 = vmor %vm333_vm15, %vm334_vm14 }
 0x781   :  { %v330_v44 = vsub.f32 1.0, %v329_v43 }
 0x783   :  { %v331_v45 = vmul.f32 %v722_v42, %v330_v44 }
 0x785   :  { %v332_v46 = vadd.f32 %v722_v42, %v331_v45 }
 0x787   :  { %v336_v49 = vsel %vm335_vm0, %v722_v42, %v332_v46 }
 0x788   :  { %v341_v52 = vsel %vm338_vm1, %v340_v50, %v336_v49 }
 0x789   :  { %v344_v54 = vmul.f32 %v341_v52, %v289_v27  ;;  %v432_v27 = vld [vmem:[#allocation2 + $0xa] sm:$0x3] }
 0x7e6   :  { %v347_v51 = vpop.permute.xlu0 %346 }
 0x7e7   :  { %v349_v53 = vmul.f32 %v347_v51, %v341_v52 }
 0x7e9   :  { %351 = vrot.lane.b32.xlu1 %v349_v53, %s759_s1 }
 0x85b   :  { %v352_v55 = vpop.permute.xlu1 %351 }
 0x85c   :  { %v354_v56 = vadd.f32 %v352_v55, %v344_v54 }
 0x85e   :  { %723 = vtanh.f32 %v354_v56 }
 0x864   :  { %v724_v57 = vpop.eup %723 }
 0x865   :  { %357 = vrot.lane.b32.xlu2 %v724_v57, %s758_s0  ;;  %v497_v57 = vld [vmem:[#allocation2 + $0xc] sm:$0x3] }
 0x8bf   :  { %v358_v58 = vpop.permute.xlu2 %357 }
 0x8c0   :  { %v839_v59 = vmul.f32 %v358_v58, %v341_v52 }
 0x8c2   :  { %v368_v60 = vpack.c.bf16 %v839_v59, %v839_v59 }
 0x8c4   :  { %370 = vrot.lane.b32.xlu0 %v368_v60, %s759_s1 }
 0x936   :  { %v371_v61 = vpop.permute.xlu0 %370 }
 0x937   :  { %670 = vmatmul.msk.bf16.vlgmr.msrb.gmra.mxu2 %vm111_vm5, %v371_v61 }
 0x9ba   :  { %v384_v63 = vpop.f32.mrf.mxu2 }
 0x9bb   :  { %v388_v0 = vadd.f32 %v384_v63, %v367_v62 }
 0x9bd   :  { %725 = vtanh.f32 %v388_v0  ;;  %v671_v4 = vmul.f32 -1.442695, %v388_v0 }
 0x9bf   :  { %727 = vpow2.f32 %v671_v4 }
 0x9c2   :  { %v386_v1 = vpop.f32.mrf.mxu2 }
 0x9c3   :  { %v726_v3 = vpop.eup %725 }
 0x9c4   :  { %411 = vrot.lane.b32.xlu1 %v726_v3, %s758_s0 }
 0x9c5   :  { %v728_v5 = vpop.eup %727 }
 0x9c6   :  { %v392_v6 = vadd.f32 1.0, %v728_v5 }
 0x9c8   :  { %729 = vrcp.f32 %v392_v6  ;;  %v404_v12 = vand.u32 2147483648, %v392_v6  ;;  %vm398_vm3 = vweird.f32 %v392_v6  ;;  %v402_v13 = vand.u32 2147483647, %v392_v6 }
 0x9ca   :  { %v405_v15 = vor.u32 1.1754944e-38, %v404_v12  ;;  %vm403_vm6 = vcmp.eq.f32.partialorder %v402_v13, 8.507059e+37 }
 0x9ce   :  { %v730_v7 = vpop.eup %729 }
 0x9cf   :  { %v394_v8 = vmul.f32 %v730_v7, %v392_v6  ;;  %vm399_vm2 = vweird.f32 %v730_v7 }
 0x9d0   :  { %vm400_vm4 = vmor %vm398_vm3, %vm399_vm2  ;;  %vm170_vm2 = vcmask 254976  }
 0x9d1   :  { %v395_v9 = vsub.f32 1.0, %v394_v8 }
 0x9d3   :  { %v396_v10 = vmul.f32 %v730_v7, %v395_v9 }
 0x9d5   :  { %v397_v11 = vadd.f32 %v730_v7, %v396_v10 }
 0x9d7   :  { %v401_v14 = vsel %vm400_vm4, %v730_v7, %v397_v11 }
 0x9d8   :  { %v406_v17 = vsel %vm403_vm6, %v405_v15, %v401_v14 }
 0x9d9   :  { %v409_v19 = vmul.f32 %v406_v17, %v354_v56 }
 0xa36   :  { %v412_v16 = vpop.permute.xlu1 %411 }
 0xa37   :  { %v414_v18 = vmul.f32 %v412_v16, %v406_v17 }
 0xa39   :  { %416 = vrot.lane.b32.xlu2 %v414_v18, %s759_s1 }
 0xa93   :  { %v417_v20 = vpop.permute.xlu2 %416 }
 0xa94   :  { %v419_v21 = vadd.f32 %v417_v20, %v409_v19 }
 0xa96   :  { %731 = vtanh.f32 %v419_v21 }
 0xa9c   :  { %v732_v22 = vpop.eup %731 }
 0xa9d   :  { %422 = vrot.lane.b32.xlu0 %v732_v22, %s758_s0 }
 0xb0f   :  { %v423_v23 = vpop.permute.xlu0 %422 }
 0xb10   :  { %v848_v24 = vmul.f32 %v423_v23, %v406_v17  ;;  %v562_v23 = vld [vmem:[#allocation2 + $0xe] sm:$0x3] }
 0xb12   :  { %v433_v25 = vpack.c.bf16 %v848_v24, %v848_v24 }
 0xb14   :  { %435 = vrot.lane.b32.xlu1 %v433_v25, %s759_s1 }
 0xb86   :  { %v436_v26 = vpop.permute.xlu1 %435 }
 0xb87   :  { %673 = vmatmul.msk.bf16.vlgmr.msrb.gmra.mxu3 %vm111_vm5, %v436_v26 }
 0xc0a   :  { %v449_v28 = vpop.f32.mrf.mxu3 }
 0xc0b   :  { %v453_v29 = vadd.f32 %v449_v28, %v432_v27 }
 0xc0d   :  { %733 = vtanh.f32 %v453_v29  ;;  %v674_v33 = vmul.f32 -1.442695, %v453_v29 }
 0xc0f   :  { %735 = vpow2.f32 %v674_v33 }
 0xc12   :  { %v451_v31 = vpop.f32.mrf.mxu3 }
 0xc13   :  { %v734_v32 = vpop.eup %733 }
 0xc14   :  { %476 = vrot.lane.b32.xlu2 %v734_v32, %s758_s0 }
 0xc15   :  { %v736_v34 = vpop.eup %735 }
 0xc16   :  { %v457_v35 = vadd.f32 1.0, %v736_v34 }
 0xc18   :  { %737 = vrcp.f32 %v457_v35  ;;  %v469_v42 = vand.u32 2147483648, %v457_v35  ;;  %vm463_vm8 = vweird.f32 %v457_v35  ;;  %v467_v43 = vand.u32 2147483647, %v457_v35 }
 0xc1a   :  { %v470_v45 = vor.u32 1.1754944e-38, %v469_v42  ;;  %vm468_vm10 = vcmp.eq.f32.partialorder %v467_v43, 8.507059e+37 }
 0xc1e   :  { %v738_v36 = vpop.eup %737 }
 0xc1f   :  { %v459_v37 = vmul.f32 %v738_v36, %v457_v35  ;;  %vm464_vm7 = vweird.f32 %v738_v36 }
 0xc20   :  { %vm465_vm9 = vmor %vm463_vm8, %vm464_vm7 }
 0xc21   :  { %v460_v39 = vsub.f32 1.0, %v459_v37 }
 0xc23   :  { %v461_v40 = vmul.f32 %v738_v36, %v460_v39 }
 0xc25   :  { %v462_v41 = vadd.f32 %v738_v36, %v461_v40 }
 0xc27   :  { %v466_v44 = vsel %vm465_vm9, %v738_v36, %v462_v41 }
 0xc28   :  { %v471_v47 = vsel %vm468_vm10, %v470_v45, %v466_v44 }
 0xc29   :  { %v474_v49 = vmul.f32 %v471_v47, %v419_v21 }
 0xc6e   :  { %v477_v46 = vpop.permute.xlu2 %476 }
 0xc6f   :  { %v479_v48 = vmul.f32 %v477_v46, %v471_v47 }
 0xc71   :  { %481 = vrot.lane.b32.xlu0 %v479_v48, %s759_s1 }
 0xce3   :  { %v482_v50 = vpop.permute.xlu0 %481 }
 0xce4   :  { %v484_v51 = vadd.f32 %v482_v50, %v474_v49 }
 0xce6   :  { %739 = vtanh.f32 %v484_v51 }
 0xcec   :  { %v740_v52 = vpop.eup %739 }
 0xced   :  { %487 = vrot.lane.b32.xlu1 %v740_v52, %s758_s0 }
 0xd5f   :  { %v488_v53 = vpop.permute.xlu1 %487 }
 0xd60   :  { %v857_v54 = vmul.f32 %v488_v53, %v471_v47 }
 0xd62   :  { %v498_v55 = vpack.c.bf16 %v857_v54, %v857_v54 }
 0xd64   :  { %500 = vrot.lane.b32.xlu2 %v498_v55, %s759_s1 }
 0xdbe   :  { %v501_v56 = vpop.permute.xlu2 %500 }
 0xdbf   :  { %676 = vmatmul.msk.bf16.vlgmr.msrb.gmra.mxu0 %vm111_vm5, %v501_v56 }
 0xe3c   :  { %v514_v58 = vpop.f32.mrf.mxu0 }
 0xe3d   :  { %v518_v60 = vadd.f32 %v514_v58, %v497_v57 }
 0xe3f   :  { %741 = vtanh.f32 %v518_v60  ;;  %v677_v63 = vmul.f32 -1.442695, %v518_v60 }
 0xe41   :  { %743 = vpow2.f32 %v677_v63 }
 0xe44   :  { %v516_v61 = vpop.f32.mrf.mxu0 }
 0xe45   :  { %v742_v62 = vpop.eup %741 }
 0xe46   :  { %541 = vrot.lane.b32.xlu0 %v742_v62, %s758_s0 }
 0xe47   :  { %v744_v0 = vpop.eup %743 }
 0xe48   :  { %v522_v1 = vadd.f32 1.0, %v744_v0 }
 0xe4a   :  { %745 = vrcp.f32 %v522_v1  ;;  %v534_v8 = vand.u32 2147483648, %v522_v1  ;;  %vm528_vm12 = vweird.f32 %v522_v1  ;;  %v532_v9 = vand.u32 2147483647, %v522_v1 }
 0xe4c   :  { %v535_v11 = vor.u32 1.1754944e-38, %v534_v8  ;;  %vm533_vm14 = vcmp.eq.f32.partialorder %v532_v9, 8.507059e+37 }
 0xe50   :  { %v746_v3 = vpop.eup %745 }
 0xe51   :  { %v524_v4 = vmul.f32 %v746_v3, %v522_v1  ;;  %vm529_vm11 = vweird.f32 %v746_v3 }
 0xe52   :  { %vm530_vm13 = vmor %vm528_vm12, %vm529_vm11 }
 0xe53   :  { %v525_v5 = vsub.f32 1.0, %v524_v4 }
 0xe55   :  { %v526_v6 = vmul.f32 %v746_v3, %v525_v5 }
 0xe57   :  { %v527_v7 = vadd.f32 %v746_v3, %v526_v6 }
 0xe59   :  { %v531_v10 = vsel %vm530_vm13, %v746_v3, %v527_v7 }
 0xe5a   :  { %v536_v13 = vsel %vm533_vm14, %v535_v11, %v531_v10 }
 0xe5b   :  { %v539_v15 = vmul.f32 %v536_v13, %v484_v51 }
 0xeb8   :  { %v542_v12 = vpop.permute.xlu0 %541 }
 0xeb9   :  { %v544_v14 = vmul.f32 %v542_v12, %v536_v13 }
 0xebb   :  { %546 = vrot.lane.b32.xlu1 %v544_v14, %s759_s1 }
 0xf2d   :  { %v547_v16 = vpop.permute.xlu1 %546 }
 0xf2e   :  { %v549_v17 = vadd.f32 %v547_v16, %v539_v15 }
 0xf30   :  { %747 = vtanh.f32 %v549_v17 }
 0xf36   :  { %v748_v18 = vpop.eup %747 }
 0xf37   :  { %552 = vrot.lane.b32.xlu2 %v748_v18, %s758_s0 }
 0xf91   :  { %v553_v19 = vpop.permute.xlu2 %552 }
 0xf92   :  { %v555_v20 = vmul.f32 %v553_v19, %v536_v13 }
 0xf94   :  { %v563_v21 = vpack.c.bf16 %v555_v20, %v555_v20 }
 0xf96   :  { %565 = vrot.lane.b32.xlu0 %v563_v21, %s759_s1 }
0x1008   :  { %v566_v22 = vpop.permute.xlu0 %565 }
0x1009   :  { %679 = vmatmul.msk.bf16.vlgmr.msra.gmra.mxu1 %vm111_vm5, %v566_v22 }
0x1086   :  { %v579_v25 = vpop.f32.mrf.mxu1 }
0x1087   :  { %v583_v26 = vadd.f32 %v579_v25, %v562_v23 }
0x1089   :  { %749 = vtanh.f32 %v583_v26  ;;  %v680_v29 = vmul.f32 -1.442695, %v583_v26 }
0x108b   :  { %751 = vpow2.f32 %v680_v29 }
0x108e   :  { %v581_v27 = vpop.f32.mrf.mxu1 }
0x108f   :  { %v750_v28 = vpop.eup %749 }
0x1090   :  { %606 = vrot.lane.b32.xlu1 %v750_v28, %s758_s0 }
0x1091   :  { %v752_v31 = vpop.eup %751 }
0x1092   :  { %v587_v32 = vadd.f32 1.0, %v752_v31 }
0x1094   :  { %753 = vrcp.f32 %v587_v32  ;;  %v599_v39 = vand.u32 2147483648, %v587_v32  ;;  %vm593_vm15 = vweird.f32 %v587_v32  ;;  %v597_v40 = vand.u32 2147483647, %v587_v32 }
0x1096   :  { %v600_v41 = vor.u32 1.1754944e-38, %v599_v39  ;;  %vm598_vm1 = vcmp.eq.f32.partialorder %v597_v40, 8.507059e+37 }
0x1098   :  { %167 = vrot.lane.b32.xlu1 %v812_v38, %s759_s1 }
0x109a   :  { %v754_v33 = vpop.eup %753 }
0x109b   :  { %v589_v34 = vmul.f32 %v754_v33, %v587_v32  ;;  %vm594_vm5 = vweird.f32 %v754_v33 }
0x109c   :  { %vm595_vm0 = vmor %vm593_vm15, %vm594_vm5 }
0x109d   :  { %v590_v35 = vsub.f32 1.0, %v589_v34 }
0x109f   :  { %v591_v36 = vmul.f32 %v754_v33, %v590_v35 }
0x10a0   :  { %362 = vrot.lane.b32.xlu1 %v839_v59, %s759_s1 }
0x10a1   :  { %v592_v37 = vadd.f32 %v754_v33, %v591_v36 }
0x10a3   :  { %v596_v38 = vsel %vm595_vm0, %v754_v33, %v592_v37 }
0x10a4   :  { %v601_v42 = vsel %vm598_vm1, %v600_v41, %v596_v38 }
0x10a5   :  { %v604_v47 = vmul.f32 %v601_v42, %v549_v17 }
0x10a8   :  { %557 = vrot.lane.b32.xlu1 %v555_v20, %s759_s1 }
0x1102   :  { %v607_v59 = vpop.permute.xlu1 %606 }
0x1103   :  { %v609_v43 = vmul.f32 %v607_v59, %v601_v42 }
0x1105   :  { %611 = vrot.lane.b32.xlu2 %v609_v43, %s759_s1 }
0x110a   :  { %v168_v44 = vpop.permute.xlu1 %167 }
0x110b   :  { %171 = vst.msk [vmem:[%s921_s4] sm:$0x3] %vm170_vm2, %v168_v44 }
0x110d   :  { %232 = vrot.lane.b32.xlu2 %v821_v2, %s759_s1 }
0x1112   :  { %v363_v45 = vpop.permute.xlu1 %362 }
0x1113   :  { %669 = vst.msk [vmem:[%s921_s4 + $0x6] sm:$0x3] %vm170_vm2, %v363_v45 }
0x1115   :  { %427 = vrot.lane.b32.xlu2 %v848_v24, %s759_s1 }
0x111a   :  { %v558_v46 = vpop.permute.xlu1 %557 }
0x111b   :  { %678 = vst.msk [vmem:[%s921_s4 + $0xc] sm:$0x3] %vm170_vm2, %v558_v46 }
0x115f   :  { %v612_v48 = vpop.permute.xlu2 %611 }
0x1160   :  { %v614_v49 = vadd.f32 %v612_v48, %v604_v47 }
0x1162   :  { %755 = vtanh.f32 %v614_v49 }
0x1167   :  { %v233_v2 = vpop.permute.xlu2 %232 }
0x1168   :  { %v756_v50 = vpop.eup %755  ;;  %663 = vst.msk [vmem:[%s921_s4 + $0x2] sm:$0x3] %vm170_vm2, %v233_v2 }
0x1169   :  { %617 = vrot.lane.b32.xlu0 %v756_v50, %s758_s0 }
0x116f   :  { %v428_v24 = vpop.permute.xlu2 %427 }
0x1170   :  { %672 = vst.msk [vmem:[%s921_s4 + $0x8] sm:$0x3] %vm170_vm2, %v428_v24 }
0x1171   :  { %297 = vrot.lane.b32.xlu0 %v830_v30, %s759_s1 }
0x1179   :  { %492 = vrot.lane.b32.xlu0 %v857_v54, %s759_s1 }
0x11db   :  { %v618_v51 = vpop.permute.xlu0 %617 }
0x11dc   :  { %v620_v52 = vmul.f32 %v618_v51, %v601_v42 }
0x11de   :  { %622 = vrot.lane.b32.xlu2 %v620_v52, %s759_s1 }
0x11e3   :  { %v298_v53 = vpop.permute.xlu0 %297 }
0x11e4   :  { %666 = vst.msk [vmem:[%s921_s4 + $0x4] sm:$0x3] %vm170_vm2, %v298_v53 }
0x11eb   :  { %v493_v55 = vpop.permute.xlu0 %492 }
0x11ec   :  { %675 = vst.msk [vmem:[%s921_s4 + $0xa] sm:$0x3] %vm170_vm2, %v493_v55 }
0x1238   :  { %v623_v30 = vpop.permute.xlu2 %622 }
0x1239   :  { %681 = vst.msk [vmem:[%s921_s4 + $0xe] sm:$0x3] %vm170_vm2, %v623_v30 }

// kernel: cnn_bilstm_crf_forward.3
= control target key start
LH: loop header
LB: loop body
LE: loop exit
PB: predicated region body
PF: predicated region fallthrough
CT: control target
= control target key end

     0   :  { %v678_v1 = vmov 0   ;;  %s864_s0 = inlined_call_operand.vmem [shape: bf16[16,32], index: 0, kind: input, shape index: {}]   ;;  %s865_s1 = inlined_call_operand.vmem [shape: bf16[32,5], index: 1, kind: input, shape index: {}]   ;;  %s866_s2 = inlined_call_operand.vmem [shape: f32[1,5], index: 2, kind: input, shape index: {}]   ;;  %s867_s3 = inlined_call_operand.vmem [shape: f32[5,5], index: 3, kind: input, shape index: {}]   ;;  %s868_s4 = inlined_call_operand.vmem [shape: f32[1,5], index: 4, kind: input, shape index: {}]   ;;  %s869_s5 = inlined_call_operand.vmem [shape: f32[1,5], index: 5, kind: input, shape index: {}]   ;;  %s870_s6 = inlined_call_operand.vmem [shape: f32[16,5], index: 6, kind: input, shape index: {}]   ;;  %s871_s7 = inlined_call_operand.vmem [shape: f32[8,2,1], index: 7, kind: input, shape index: {}]   ;;  %s872_s8 = inlined_call_operand.vmem [shape: f32[2,1], index: 8, kind: output, shape index: {0}]   ;;  %s873_s9 = inlined_call_operand.hbm [shape: f32[1,1], index: 9, kind: output, shape index: {1}]  }
   0x1   :  { %v581_v0 = vld [vmem:[%s865_s1 + $0x8] sm:$0xff]  ;;  %586 = vset.pattern.permute.xlu2 %v678_v1  ;;  %v572_v2 = vld [vmem:[%s871_s7 + $0x2] sm:$0x3]  ;;  %587 = vset.pattern.permute.xlu1 %v678_v1 }
   0x2   :  { %70 = vmatpush.bf16.msra.mxu0 %v581_v0  ;;  %v580_v3 = vld [vmem:[%s865_s1] sm:$0xff]  ;;  %172 = vperm.xlu2 %586, %v572_v2  }
   0x3   :  { %588 = vset.pattern.permute.xlu0 %v678_v1 }
   0x4   :  { %15 = vsyncpa [#allocation4], 0  ;;  %v579_v4 = vld [vmem:[%s864_s0] sm:$0xff]  ;;  %vm60_vm0 = vcmask 261120   ;;  %v176_v5 = vsub.f32 1.0, %v572_v2  ;;  %vm98_vm1 = vcmask 33792   ;;  %v160_v43 = vlaneseq }
   0x5   :  { %v589_v6 = vld [vmem:[%s866_s2] ss:$0 sm:$0xff]  ;;  %vm101_vm2 = vcmask 35842   ;;  %vm104_vm3 = vcmask 37892   ;;  %vm107_vm4 = vcmask 39942   ;;  %v79_v12 = vld [vmem:[%s870_s6 + $0x8] sm:$0xff] }
   0x6   :  { %71 = vmatpush.bf16.msra.mxu0 %v580_v3  ;;  %v590_v9 = vld [vmem:[%s868_s4] ss:$0 sm:$0xff]  ;;  %vm82_vm5 = vcmask 39936   ;;  %vm132_vm6 = vcmask 36864   ;;  %v775_v46 = vand.u32 127, %v160_v43  ;;  %vm164_vm7 = vcmask 1041409  }
   0x7   :  { %v78_v10 = vld [vmem:[%s870_s6] sm:$0xff]  ;;  %vm96_vm8 = vcmask 0   ;;  %s548_s15 = sshll.u32 %s873_s9, 4  ;;  %s679_s16 = smov [#allocation3]   ;;  %vm537_vm9 = vcmask 1024   ;;  %s549_s15 = int_to_ptr.hbm [resolvable:$true] %s548_s15 }
   0x8   :  { %v763_v18 = vld [vmem:[%s867_s3] sm:$0x1f]  ;;  %s546_s17 = sshll.u32 %s679_s16, 4  ;;  %s547_s17 = int_to_ptr.vmem [resolvable:$true] %s546_s17 }
   0x9   :  { %571 = vmatmul.msk.bf16.vlgmr.msra.gmra.mxu0 %vm60_vm0, %v579_v4  ;;  %v573_v2 = vld [vmem:[%s871_s7 + $0x4] sm:$0x3] }
   0xa   :  { %179 = vperm.xlu2 %586, %v176_v5  }
  0x5c   :  { %v173_v42 = vpop.permute.xlu2 %172 }
  0x64   :  { %v180_v52 = vpop.permute.xlu2 %179 }
  0x86   :  { %v73_v7 = vpop.f32.mrf.mxu0 }
  0x87   :  { %v74_v8 = vadd.f32 %v589_v6, %v73_v7 }
  0x89   :  { %99 = vst.msk [vmem:[#allocation2] sm:$0x3] %vm98_vm1, %v74_v8  ;;  %v80_v15 = vmul.f32 %v78_v10, %v74_v8 }
  0x8a   :  { %102 = vst.msk [vmem:[#allocation2] sm:$0xc] %vm101_vm2, %v74_v8 }
  0x8b   :  { %105 = vst.msk [vmem:[#allocation2] sm:$0x30] %vm104_vm3, %v74_v8  ;;  %v83_v21 = vsel %vm82_vm5, %v80_v15, 0.0 }
  0x8c   :  { %108 = vst.msk [vmem:[#allocation2] sm:$0xc0] %vm107_vm4, %v74_v8 }
  0x8e   :  { %v75_v11 = vpop.f32.mrf.mxu0 }
  0x8f   :  { %v76_v13 = vadd.f32 %v589_v6, %v75_v11 }
  0x90   :  { %v118_v14 = vld [vmem:[#allocation2] sm:$0x3] }
  0x91   :  { %110 = vst.msk [vmem:[#allocation2 + $0x8] sm:$0x3] %vm98_vm1, %v76_v13  ;;  %v123_v16 = vadd.f32 %v590_v9, %v118_v14  ;;  %v81_v17 = vmul.f32 %v79_v12, %v76_v13  ;;  %v157_v53 = vld [vmem:[#allocation2 + $0x2] sm:$0x3] }
  0x92   :  { %112 = vst.msk [vmem:[#allocation2 + $0x8] sm:$0xc] %vm101_vm2, %v76_v13 }
  0x93   :  { %114 = vst.msk [vmem:[#allocation2 + $0x8] sm:$0x30] %vm104_vm3, %v76_v13  ;;  %v126_v19 = vperm.slane %v123_v16, 0  ;;  %v125_v20 = vrot.slane %v123_v16, 1  ;;  %v84_v22 = vsel %vm82_vm5, %v81_v17, 0.0  ;;  %v182_v56 = vmul.f32 %v180_v52, %v123_v16 }
  0x94   :  { %116 = vst.msk [vmem:[#allocation2 + $0x8] sm:$0xc0] %vm107_vm4, %v76_v13  ;;  %v768_v24 = vadd.f32 %v84_v22, %v83_v21  ;;  %v232_v13 = vsub.f32 1.0, %v573_v2 }
  0x95   :  { %v130_v23 = vadd.f32 %v126_v19, %v763_v18  ;;  %v127_v26 = vperm.slane %v125_v20, 0 }
  0x97   :  { %v133_v25 = vsel %vm132_vm6, %v130_v23, -inf  ;;  %v131_v27 = vadd.f32 %v127_v26, %v763_v18 }
  0x98   :  { %134 = vmax.xlane.f32.xlu0 %v133_v25 }
  0x99   :  { %v136_v28 = vsel %vm132_vm6, %v131_v27, -inf }
  0xa0   :  { %137 = vmax.xlane.f32.xlu0 %v136_v28 }
 0x10b   :  { %v135_v29 = vpop.xlane.xlu0 %134 }
 0x10c   :  { %v139_v30 = vsub.f32 %v130_v23, %v135_v29 }
 0x10e   :  { %v141_v31 = vmul.f32 1.442695, %v139_v30 }
 0x110   :  { %592 = vpow2.f32 %v141_v31 }
 0x113   :  { %v138_v32 = vpop.xlane.xlu0 %137 }
 0x114   :  { %v140_v33 = vsub.f32 %v131_v27, %v138_v32  ;;  %v216_v27 = vld [vmem:[#allocation2 + $0x4] sm:$0x3] }
 0x116   :  { %v593_v34 = vpop.eup %592  ;;  %v143_v35 = vmul.f32 1.442695, %v140_v33 }
 0x117   :  { %v145_v36 = vsel %vm132_vm6, %v593_v34, 0.0 }
 0x118   :  { %594 = vpow2.f32 %v143_v35  ;;  %146 = vadd.xlane.f32.xlu1 %v145_v36 }
 0x11e   :  { %v595_v37 = vpop.eup %594 }
 0x11f   :  { %v148_v38 = vsel %vm132_vm6, %v595_v37, 0.0 }
 0x120   :  { %149 = vadd.xlane.f32.xlu1 %v148_v38 }
 0x18b   :  { %v147_v39 = vpop.xlane.xlu1 %146 }
 0x18c   :  { %596 = vlog2.f32 %v147_v39 }
 0x192   :  { %v597_v41 = vpop.eup %596 }
 0x193   :  { %v150_v40 = vpop.xlane.xlu1 %149  ;;  %v152_v44 = vmul.f32 0.6931472, %v597_v41  ;;  %v574_v41 = vld [vmem:[%s871_s7 + $0x6] sm:$0x3] }
 0x194   :  { %598 = vlog2.f32 %v150_v40 }
 0x195   :  { %v155_v47 = vadd.f32 %v152_v44, %v135_v29 }
 0x197   :  { %v162_v50 = vperm.slane %v155_v47, %v775_v46 }
 0x19a   :  { %v599_v45 = vpop.eup %598 }
 0x19b   :  { %v154_v48 = vmul.f32 0.6931472, %v599_v45 }
 0x19d   :  { %v156_v49 = vadd.f32 %v154_v48, %v138_v32 }
 0x19f   :  { %v163_v51 = vperm.slane %v156_v49, %v775_v46 }
 0x1a1   :  { %v165_v54 = vsel %vm164_vm7, %v163_v51, %v162_v50 }
 0x1a2   :  { %v167_v55 = vadd.f32 %v165_v54, %v157_v53 }
 0x1a4   :  { %v175_v57 = vmul.f32 %v173_v42, %v167_v55  ;;  %v288_v42 = vsub.f32 1.0, %v574_v41 }
 0x1a6   :  { %v183_v58 = vadd.f32 %v182_v56, %v175_v57 }
 0x1a8   :  { %v186_v59 = vperm.slane %v183_v58, 0  ;;  %v185_v60 = vrot.slane %v183_v58, 1 }
 0x1aa   :  { %v190_v61 = vadd.f32 %v186_v59, %v763_v18  ;;  %v187_v62 = vperm.slane %v185_v60, 0 }
 0x1ac   :  { %v192_v63 = vsel %vm132_vm6, %v190_v61, -inf  ;;  %v191_v0 = vadd.f32 %v187_v62, %v763_v18 }
 0x1ad   :  { %193 = vmax.xlane.f32.xlu0 %v192_v63 }
 0x1ae   :  { %v195_v1 = vsel %vm132_vm6, %v191_v0, -inf }
 0x1af   :  { %196 = vmax.xlane.f32.xlu1 %v195_v1  ;;  %v272_v1 = vld [vmem:[#allocation2 + $0x6] sm:$0x3] }
 0x1c8   :  { %228 = vperm.xlu1 %587, %v573_v2  }
 0x220   :  { %v194_v3 = vpop.xlane.xlu0 %193 }
 0x221   :  { %v198_v4 = vsub.f32 %v190_v61, %v194_v3 }
 0x222   :  { %v197_v5 = vpop.xlane.xlu1 %196 }
 0x223   :  { %v200_v6 = vmul.f32 1.442695, %v198_v4  ;;  %v199_v7 = vsub.f32 %v191_v0, %v197_v5 }
 0x225   :  { %600 = vpow2.f32 %v200_v6  ;;  %v202_v8 = vmul.f32 1.442695, %v199_v7 }
 0x227   :  { %602 = vpow2.f32 %v202_v8 }
 0x22b   :  { %v601_v9 = vpop.eup %600 }
 0x22c   :  { %v204_v10 = vsel %vm132_vm6, %v601_v9, 0.0 }
 0x22d   :  { %v603_v11 = vpop.eup %602  ;;  %205 = vadd.xlane.f32.xlu2 %v204_v10 }
 0x22e   :  { %v207_v12 = vsel %vm132_vm6, %v603_v11, 0.0 }
 0x22f   :  { %208 = vadd.xlane.f32.xlu0 %v207_v12 }
 0x23a   :  { %v229_v29 = vpop.permute.xlu1 %228 }
 0x243   :  { %235 = vperm.xlu0 %588, %v232_v13  }
 0x2a0   :  { %v206_v14 = vpop.xlane.xlu2 %205 }
 0x2a1   :  { %604 = vlog2.f32 %v206_v14 }
 0x2a2   :  { %v209_v15 = vpop.xlane.xlu0 %208 }
 0x2a3   :  { %606 = vlog2.f32 %v209_v15  ;;  %v575_v15 = vld [vmem:[%s871_s7 + $0x8] sm:$0x3] }
 0x2a7   :  { %v605_v16 = vpop.eup %604 }
 0x2a8   :  { %v211_v17 = vmul.f32 0.6931472, %v605_v16  ;;  %v344_v16 = vsub.f32 1.0, %v575_v15 }
 0x2a9   :  { %v607_v19 = vpop.eup %606 }
 0x2aa   :  { %v214_v20 = vadd.f32 %v211_v17, %v194_v3  ;;  %v213_v21 = vmul.f32 0.6931472, %v607_v19 }
 0x2ac   :  { %v215_v22 = vadd.f32 %v213_v21, %v197_v5  ;;  %v219_v23 = vperm.slane %v214_v20, %v775_v46 }
 0x2ae   :  { %v220_v25 = vperm.slane %v215_v22, %v775_v46 }
 0x2b0   :  { %v221_v26 = vsel %vm164_vm7, %v220_v25, %v219_v23 }
 0x2b1   :  { %v223_v28 = vadd.f32 %v221_v26, %v216_v27 }
 0x2b3   :  { %v231_v31 = vmul.f32 %v229_v29, %v223_v28 }
 0x2b5   :  { %v236_v30 = vpop.permute.xlu0 %235 }
 0x2b6   :  { %v238_v32 = vmul.f32 %v236_v30, %v183_v58 }
 0x2b8   :  { %v239_v33 = vadd.f32 %v238_v32, %v231_v31 }
 0x2ba   :  { %v242_v34 = vperm.slane %v239_v33, 0  ;;  %v241_v35 = vrot.slane %v239_v33, 1 }
 0x2bc   :  { %v246_v36 = vadd.f32 %v242_v34, %v763_v18  ;;  %v243_v37 = vperm.slane %v241_v35, 0 }
 0x2be   :  { %v248_v38 = vsel %vm132_vm6, %v246_v36, -inf  ;;  %v247_v39 = vadd.f32 %v243_v37, %v763_v18 }
 0x2bf   :  { %249 = vmax.xlane.f32.xlu1 %v248_v38 }
 0x2c0   :  { %v251_v40 = vsel %vm132_vm6, %v247_v39, -inf }
 0x2c1   :  { %252 = vmax.xlane.f32.xlu2 %v251_v40 }
 0x2d8   :  { %291 = vperm.xlu1 %587, %v288_v42  }
 0x332   :  { %v250_v43 = vpop.xlane.xlu1 %249 }
 0x333   :  { %v254_v44 = vsub.f32 %v246_v36, %v250_v43 }
 0x334   :  { %v253_v45 = vpop.xlane.xlu2 %252 }
 0x335   :  { %v256_v47 = vmul.f32 1.442695, %v254_v44  ;;  %v255_v48 = vsub.f32 %v247_v39, %v253_v45 }
 0x337   :  { %608 = vpow2.f32 %v256_v47  ;;  %v258_v49 = vmul.f32 1.442695, %v255_v48 }
 0x339   :  { %610 = vpow2.f32 %v258_v49 }
 0x33d   :  { %v609_v50 = vpop.eup %608 }
 0x33e   :  { %v260_v51 = vsel %vm132_vm6, %v609_v50, 0.0 }
 0x33f   :  { %v611_v52 = vpop.eup %610  ;;  %261 = vadd.xlane.f32.xlu2 %v260_v51 }
 0x340   :  { %v263_v53 = vsel %vm132_vm6, %v611_v52, 0.0 }
 0x341   :  { %264 = vadd.xlane.f32.xlu0 %v263_v53 }
 0x34a   :  { %v292_v0 = vpop.permute.xlu1 %291 }
 0x34b   :  { %v294_v5 = vmul.f32 %v292_v0, %v239_v33 }
 0x357   :  { %284 = vperm.xlu2 %586, %v574_v41   ;;  %v328_v41 = vld [vmem:[#allocation2 + $0x8] sm:$0x3] }
 0x3b2   :  { %v262_v54 = vpop.xlane.xlu2 %261 }
 0x3b3   :  { %612 = vlog2.f32 %v262_v54 }
 0x3b4   :  { %v265_v55 = vpop.xlane.xlu0 %264 }
 0x3b5   :  { %614 = vlog2.f32 %v265_v55  ;;  %v576_v55 = vld [vmem:[%s871_s7 + $0xa] sm:$0x3] }
 0x3b9   :  { %v613_v56 = vpop.eup %612 }
 0x3ba   :  { %v267_v57 = vmul.f32 0.6931472, %v613_v56  ;;  %v285_v4 = vpop.permute.xlu2 %284  ;;  %v400_v56 = vsub.f32 1.0, %v576_v55 }
 0x3bb   :  { %v615_v58 = vpop.eup %614 }
 0x3bc   :  { %v270_v59 = vadd.f32 %v267_v57, %v250_v43  ;;  %v269_v60 = vmul.f32 0.6931472, %v615_v58 }
 0x3be   :  { %v271_v61 = vadd.f32 %v269_v60, %v253_v45  ;;  %v275_v62 = vperm.slane %v270_v59, %v775_v46 }
 0x3c0   :  { %v276_v63 = vperm.slane %v271_v61, %v775_v46 }
 0x3c2   :  { %v277_v2 = vsel %vm164_vm7, %v276_v63, %v275_v62 }
 0x3c3   :  { %v279_v3 = vadd.f32 %v277_v2, %v272_v1 }
 0x3c5   :  { %v287_v6 = vmul.f32 %v285_v4, %v279_v3 }
 0x3c7   :  { %v295_v7 = vadd.f32 %v294_v5, %v287_v6 }
 0x3c9   :  { %v298_v8 = vperm.slane %v295_v7, 0  ;;  %v297_v9 = vrot.slane %v295_v7, 1 }
 0x3cb   :  { %v302_v10 = vadd.f32 %v298_v8, %v763_v18  ;;  %v299_v11 = vperm.slane %v297_v9, 0 }
 0x3cd   :  { %v304_v12 = vsel %vm132_vm6, %v302_v10, -inf  ;;  %v303_v13 = vadd.f32 %v299_v11, %v763_v18 }
 0x3ce   :  { %305 = vmax.xlane.f32.xlu2 %v304_v12 }
 0x3cf   :  { %v307_v14 = vsel %vm132_vm6, %v303_v13, -inf }
 0x3d0   :  { %308 = vmax.xlane.f32.xlu0 %v307_v14 }
 0x3e6   :  { %347 = vperm.xlu2 %586, %v344_v16  }
 0x441   :  { %v306_v17 = vpop.xlane.xlu2 %305 }
 0x442   :  { %v310_v19 = vsub.f32 %v302_v10, %v306_v17 }
 0x443   :  { %v309_v20 = vpop.xlane.xlu0 %308 }
 0x444   :  { %v312_v21 = vmul.f32 1.442695, %v310_v19  ;;  %v311_v22 = vsub.f32 %v303_v13, %v309_v20 }
 0x446   :  { %616 = vpow2.f32 %v312_v21  ;;  %v314_v23 = vmul.f32 1.442695, %v311_v22 }
 0x448   :  { %618 = vpow2.f32 %v314_v23 }
 0x449   :  { %v348_v40 = vpop.permute.xlu2 %347 }
 0x44a   :  { %v350_v44 = vmul.f32 %v348_v40, %v295_v7 }
 0x44c   :  { %v617_v25 = vpop.eup %616 }
 0x44d   :  { %v316_v26 = vsel %vm132_vm6, %v617_v25, 0.0 }
 0x44e   :  { %v619_v27 = vpop.eup %618  ;;  %317 = vadd.xlane.f32.xlu1 %v316_v26 }
 0x44f   :  { %v319_v28 = vsel %vm132_vm6, %v619_v27, 0.0 }
 0x450   :  { %320 = vadd.xlane.f32.xlu0 %v319_v28 }
 0x464   :  { %340 = vperm.xlu0 %588, %v575_v15   ;;  %v384_v15 = vld [vmem:[#allocation2 + $0xa] sm:$0x3] }
 0x4c1   :  { %v318_v29 = vpop.xlane.xlu1 %317 }
 0x4c2   :  { %620 = vlog2.f32 %v318_v29 }
 0x4c3   :  { %v321_v30 = vpop.xlane.xlu0 %320 }
 0x4c4   :  { %622 = vlog2.f32 %v321_v30  ;;  %v577_v30 = vld [vmem:[%s871_s7 + $0xc] sm:$0x3] }
 0x4c8   :  { %v621_v31 = vpop.eup %620 }
 0x4c9   :  { %v323_v32 = vmul.f32 0.6931472, %v621_v31  ;;  %v456_v31 = vsub.f32 1.0, %v577_v30 }
 0x4ca   :  { %v623_v33 = vpop.eup %622 }
 0x4cb   :  { %v325_v34 = vmul.f32 0.6931472, %v623_v33  ;;  %v326_v35 = vadd.f32 %v323_v32, %v306_v17 }
 0x4cd   :  { %v327_v36 = vadd.f32 %v325_v34, %v309_v20  ;;  %v331_v38 = vperm.slane %v326_v35, %v775_v46 }
 0x4cf   :  { %v332_v37 = vperm.slane %v327_v36, %v775_v46 }
 0x4d1   :  { %v333_v39 = vsel %vm164_vm7, %v332_v37, %v331_v38 }
 0x4d2   :  { %v335_v42 = vadd.f32 %v333_v39, %v328_v41 }
 0x4d6   :  { %v341_v43 = vpop.permute.xlu0 %340 }
 0x4d7   :  { %v343_v45 = vmul.f32 %v341_v43, %v335_v42 }
 0x4d9   :  { %v351_v47 = vadd.f32 %v350_v44, %v343_v45 }
 0x4db   :  { %v354_v48 = vperm.slane %v351_v47, 0  ;;  %v353_v49 = vrot.slane %v351_v47, 1 }
 0x4dd   :  { %v358_v50 = vadd.f32 %v354_v48, %v763_v18  ;;  %v355_v51 = vperm.slane %v353_v49, 0 }
 0x4df   :  { %v360_v52 = vsel %vm132_vm6, %v358_v50, -inf  ;;  %v359_v53 = vadd.f32 %v355_v51, %v763_v18 }
 0x4e0   :  { %361 = vmax.xlane.f32.xlu0 %v360_v52 }
 0x4e1   :  { %v363_v54 = vsel %vm132_vm6, %v359_v53, -inf }
 0x4e2   :  { %364 = vmax.xlane.f32.xlu1 %v363_v54  ;;  %v440_v54 = vld [vmem:[#allocation2 + $0xc] sm:$0x3] }
 0x4f4   :  { %403 = vperm.xlu0 %588, %v400_v56  }
 0x553   :  { %v362_v57 = vpop.xlane.xlu0 %361 }
 0x554   :  { %v366_v58 = vsub.f32 %v358_v50, %v362_v57 }
 0x555   :  { %v365_v59 = vpop.xlane.xlu1 %364 }
 0x556   :  { %v368_v60 = vmul.f32 1.442695, %v366_v58  ;;  %v367_v61 = vsub.f32 %v359_v53, %v365_v59 }
 0x558   :  { %624 = vpow2.f32 %v368_v60  ;;  %v370_v62 = vmul.f32 1.442695, %v367_v61 }
 0x55a   :  { %626 = vpow2.f32 %v370_v62 }
 0x55e   :  { %v625_v63 = vpop.eup %624 }
 0x55f   :  { %v372_v0 = vsel %vm132_vm6, %v625_v63, 0.0 }
 0x560   :  { %v627_v1 = vpop.eup %626  ;;  %373 = vadd.xlane.f32.xlu2 %v372_v0 }
 0x561   :  { %v375_v2 = vsel %vm132_vm6, %v627_v1, 0.0 }
 0x562   :  { %376 = vadd.xlane.f32.xlu1 %v375_v2 }
 0x566   :  { %v404_v14 = vpop.permute.xlu0 %403 }
 0x567   :  { %v406_v19 = vmul.f32 %v404_v14, %v351_v47 }
 0x57b   :  { %396 = vperm.xlu1 %587, %v576_v55  }
 0x5d3   :  { %v374_v3 = vpop.xlane.xlu2 %373 }
 0x5d4   :  { %628 = vlog2.f32 %v374_v3 }
 0x5d5   :  { %v377_v4 = vpop.xlane.xlu1 %376 }
 0x5d6   :  { %630 = vlog2.f32 %v377_v4  ;;  %v578_v4 = vld [vmem:[%s871_s7 + $0xe] sm:$0x3] }
 0x5da   :  { %v629_v5 = vpop.eup %628 }
 0x5db   :  { %v379_v8 = vmul.f32 0.6931472, %v629_v5  ;;  %v512_v5 = vsub.f32 1.0, %v578_v4 }
 0x5dc   :  { %v631_v6 = vpop.eup %630 }
 0x5dd   :  { %v381_v7 = vmul.f32 0.6931472, %v631_v6  ;;  %v382_v10 = vadd.f32 %v379_v8, %v362_v57 }
 0x5df   :  { %v383_v9 = vadd.f32 %v381_v7, %v365_v59  ;;  %v387_v12 = vperm.slane %v382_v10, %v775_v46 }
 0x5e1   :  { %v388_v11 = vperm.slane %v383_v9, %v775_v46 }
 0x5e3   :  { %v389_v13 = vsel %vm164_vm7, %v388_v11, %v387_v12 }
 0x5e4   :  { %v391_v16 = vadd.f32 %v389_v13, %v384_v15 }
 0x5ed   :  { %v397_v17 = vpop.permute.xlu1 %396 }
 0x5ee   :  { %v399_v20 = vmul.f32 %v397_v17, %v391_v16 }
 0x5f0   :  { %v407_v21 = vadd.f32 %v406_v19, %v399_v20 }
 0x5f2   :  { %v410_v22 = vperm.slane %v407_v21, 0  ;;  %v409_v23 = vrot.slane %v407_v21, 1 }
 0x5f4   :  { %v414_v25 = vadd.f32 %v410_v22, %v763_v18  ;;  %v411_v26 = vperm.slane %v409_v23, 0 }
 0x5f6   :  { %v416_v27 = vsel %vm132_vm6, %v414_v25, -inf  ;;  %v415_v28 = vadd.f32 %v411_v26, %v763_v18 }
 0x5f7   :  { %417 = vmax.xlane.f32.xlu1 %v416_v27  ;;  %v496_v27 = vld [vmem:[#allocation2 + $0xe] sm:$0x3] }
 0x5f8   :  { %v419_v29 = vsel %vm132_vm6, %v415_v28, -inf }
 0x5f9   :  { %420 = vmax.xlane.f32.xlu2 %v419_v29 }
 0x610   :  { %459 = vperm.xlu1 %587, %v456_v31  }
 0x66a   :  { %v418_v32 = vpop.xlane.xlu1 %417 }
 0x66b   :  { %v422_v33 = vsub.f32 %v414_v25, %v418_v32 }
 0x66c   :  { %v421_v34 = vpop.xlane.xlu2 %420 }
 0x66d   :  { %v424_v35 = vmul.f32 1.442695, %v422_v33  ;;  %v423_v36 = vsub.f32 %v415_v28, %v421_v34  ;;  %v591_v33 = vld [vmem:[%s869_s5] ss:$0 sm:$0xff] }
 0x66f   :  { %632 = vpow2.f32 %v424_v35  ;;  %v426_v37 = vmul.f32 1.442695, %v423_v36 }
 0x671   :  { %634 = vpow2.f32 %v426_v37 }
 0x675   :  { %v633_v38 = vpop.eup %632 }
 0x676   :  { %v428_v39 = vsel %vm132_vm6, %v633_v38, 0.0 }
 0x677   :  { %v635_v40 = vpop.eup %634  ;;  %429 = vadd.xlane.f32.xlu2 %v428_v39 }
 0x678   :  { %v431_v41 = vsel %vm132_vm6, %v635_v40, 0.0 }
 0x679   :  { %432 = vadd.xlane.f32.xlu0 %v431_v41 }
 0x682   :  { %v460_v53 = vpop.permute.xlu1 %459 }
 0x683   :  { %v462_v58 = vmul.f32 %v460_v53, %v407_v21 }
 0x68f   :  { %452 = vperm.xlu2 %586, %v577_v30  }
 0x6ea   :  { %v430_v42 = vpop.xlane.xlu2 %429 }
 0x6eb   :  { %636 = vlog2.f32 %v430_v42 }
 0x6ec   :  { %v433_v43 = vpop.xlane.xlu0 %432 }
 0x6ed   :  { %638 = vlog2.f32 %v433_v43 }
 0x6f1   :  { %v637_v44 = vpop.eup %636 }
 0x6f2   :  { %v435_v45 = vmul.f32 0.6931472, %v637_v44  ;;  %v453_v57 = vpop.permute.xlu2 %452 }
 0x6f3   :  { %v639_v47 = vpop.eup %638 }
 0x6f4   :  { %v438_v48 = vadd.f32 %v435_v45, %v418_v32  ;;  %v437_v49 = vmul.f32 0.6931472, %v639_v47 }
 0x6f6   :  { %v439_v50 = vadd.f32 %v437_v49, %v421_v34  ;;  %v443_v51 = vperm.slane %v438_v48, %v775_v46 }
 0x6f8   :  { %v444_v52 = vperm.slane %v439_v50, %v775_v46 }
 0x6fa   :  { %v445_v55 = vsel %vm164_vm7, %v444_v52, %v443_v51 }
 0x6fb   :  { %v447_v56 = vadd.f32 %v445_v55, %v440_v54 }
 0x6fd   :  { %v455_v59 = vmul.f32 %v453_v57, %v447_v56 }
 0x6ff   :  { %v463_v60 = vadd.f32 %v462_v58, %v455_v59 }
 0x701   :  { %v466_v61 = vperm.slane %v463_v60, 0  ;;  %v465_v62 = vrot.slane %v463_v60, 1 }
 0x703   :  { %v470_v63 = vadd.f32 %v466_v61, %v763_v18  ;;  %v467_v0 = vperm.slane %v465_v62, 0 }
 0x705   :  { %v472_v1 = vsel %vm132_vm6, %v470_v63, -inf  ;;  %v471_v2 = vadd.f32 %v467_v0, %v763_v18 }
 0x706   :  { %473 = vmax.xlane.f32.xlu2 %v472_v1 }
 0x707   :  { %v475_v3 = vsel %vm132_vm6, %v471_v2, -inf }
 0x708   :  { %476 = vmax.xlane.f32.xlu0 %v475_v3 }
 0x71e   :  { %515 = vperm.xlu2 %586, %v512_v5  }
 0x779   :  { %v474_v6 = vpop.xlane.xlu2 %473 }
 0x77a   :  { %v478_v7 = vsub.f32 %v470_v63, %v474_v6 }
 0x77b   :  { %v477_v8 = vpop.xlane.xlu0 %476 }
 0x77c   :  { %v480_v9 = vmul.f32 1.442695, %v478_v7  ;;  %v479_v10 = vsub.f32 %v471_v2, %v477_v8 }
 0x77e   :  { %640 = vpow2.f32 %v480_v9  ;;  %v482_v11 = vmul.f32 1.442695, %v479_v10 }
 0x780   :  { %642 = vpow2.f32 %v482_v11 }
 0x781   :  { %v516_v29 = vpop.permute.xlu2 %515 }
 0x782   :  { %v518_v31 = vmul.f32 %v516_v29, %v463_v60 }
 0x784   :  { %v641_v12 = vpop.eup %640 }
 0x785   :  { %v484_v18 = vsel %vm132_vm6, %v641_v12, 0.0 }
 0x786   :  { %v643_v13 = vpop.eup %642  ;;  %485 = vadd.xlane.f32.xlu0 %v484_v18 }
 0x787   :  { %v487_v14 = vsel %vm132_vm6, %v643_v13, 0.0 }
 0x788   :  { %488 = vadd.xlane.f32.xlu1 %v487_v14 }
 0x79a   :  { %508 = vperm.xlu0 %588, %v578_v4  }
 0x7c4   :  { %86 = vadd.xlane.f32.xlu0 %v768_v24 }
 0x7f9   :  { %v486_v15 = vpop.xlane.xlu0 %485 }
 0x7fa   :  { %644 = vlog2.f32 %v486_v15 }
 0x7fb   :  { %v489_v16 = vpop.xlane.xlu1 %488 }
 0x7fc   :  { %646 = vlog2.f32 %v489_v16 }
 0x800   :  { %v645_v17 = vpop.eup %644 }
 0x801   :  { %v491_v19 = vmul.f32 0.6931472, %v645_v17 }
 0x802   :  { %v647_v20 = vpop.eup %646 }
 0x803   :  { %v494_v21 = vadd.f32 %v491_v19, %v474_v6  ;;  %v493_v22 = vmul.f32 0.6931472, %v647_v20 }
 0x805   :  { %v495_v23 = vadd.f32 %v493_v22, %v477_v8  ;;  %v499_v25 = vperm.slane %v494_v21, %v775_v46 }
 0x807   :  { %v500_v26 = vperm.slane %v495_v23, %v775_v46 }
 0x809   :  { %v501_v28 = vsel %vm164_vm7, %v500_v26, %v499_v25 }
 0x80a   :  { %v503_v30 = vadd.f32 %v501_v28, %v496_v27 }
 0x80c   :  { %v509_v24 = vpop.permute.xlu0 %508 }
 0x80d   :  { %v511_v32 = vmul.f32 %v509_v24, %v503_v30 }
 0x80f   :  { %v519_v34 = vadd.f32 %v518_v31, %v511_v32 }
 0x811   :  { %v524_v35 = vadd.f32 %v591_v33, %v519_v34 }
 0x813   :  { %v525_v36 = vsel %vm98_vm1, %v524_v35, -inf }
 0x814   :  { %526 = vmax.xlane.f32.xlu1 %v525_v36 }
 0x837   :  { %v87_v37 = vpop.xlane.xlu0 %86 }
 0x838   :  { %v88_v38 = vrot.slane %v87_v37, 4 }
 0x83a   :  { %v89_v46 = vadd.f32 %v88_v38, %v87_v37 }
 0x83c   :  { %v90_v39 = vrot.slane %v89_v46, 2 }
 0x83e   :  { %v91_v40 = vadd.f32 %v90_v39, %v89_v46 }
 0x840   :  { %v92_v41 = vrot.slane %v91_v40, 1 }
 0x842   :  { %v93_v42 = vadd.f32 %v92_v41, %v91_v40 }
 0x844   :  { %582 = vpush %v93_v42 }
 0x875   :  { %s583_s13 = spop %582 }
 0x876   :  { %v95_v43 = vstv %s583_s13 }
 0x877   :  { %97 = vst.msk [vmem:[#allocation3] sm:$0x1] %vm96_vm8, %v95_v43 }
 0x878   :  { %551 = dma.vmem_to_hbm [thread:$0]  %s547_s17, 16, %s549_s15, [#allocation4]  }
 0x887   :  { %v527_v44 = vpop.xlane.xlu1 %526 }
 0x888   :  { %v528_v45 = vsub.f32 %v524_v35, %v527_v44 }
 0x88a   :  { %v529_v47 = vmul.f32 1.442695, %v528_v45 }
 0x88c   :  { %648 = vpow2.f32 %v529_v47 }
 0x892   :  { %v649_v48 = vpop.eup %648 }
 0x893   :  { %v531_v49 = vsel %vm98_vm1, %v649_v48, 0.0 }
 0x894   :  { %532 = vadd.xlane.f32.xlu2 %v531_v49 }
 0x907   :  { %v533_v50 = vpop.xlane.xlu2 %532 }
 0x908   :  { %650 = vlog2.f32 %v533_v50 }
 0x90e   :  { %v651_v51 = vpop.eup %650 }
 0x90f   :  { %v535_v52 = vmul.f32 0.6931472, %v651_v51 }
 0x911   :  { %v536_v53 = vadd.f32 %v535_v52, %v527_v44 }
 0x913   :  { %538 = vst.msk [vmem:[%s872_s8] sm:$0x3] %vm537_vm9, %v536_v53 }
 0x914   :  { %676 = dma.done.wait [#allocation4], 16  }
 0x915   :  { %677 = vsyncadd [#allocation4], 4294967280 }
 0x916   :  { %558 = vsyncpa [#allocation4], 1 }

</bundles_post_ra>
